<compile_context>
chip_gen: v7x
topology: tpu7x:2x2x1
jax: 0.10.0
libtpu: 0.0.40
codegen_flags: <defaults>
</compile_context>

<pallas_src>
import functools

import jax
import jax.numpy as jnp
import numpy as np
from jax.experimental import pallas as pl
from jax.experimental.pallas import tpu as pltpu


# Top padding rows in the mid scratch so the interior store starts on a
# packed-sublane (bf16: 16-row) boundary.  Only row _TOP-1 is semantically the
# top zero border; rows 0.._TOP-2 are never read.
_TOP = 16


def _fused_decoder_kernel(x_ref, w1_ref, b1_ref, w2_ref, b2_ref, o_ref,
                          mid_ref, *, H):
    """Fused Conv3x3+ReLU -> ConvTranspose4x4(s2,p1)+ReLU for one image.

    x_ref:   (1, H+2, (W+2)*Cin)        zero-padded, channel-packed input rows
    w1_ref:  (3, (W+2)*Cin, (W+2)*Cmid) column-banded conv1 weights (per kernel row)
    b1_ref:  (1, (W+2)*Cmid)            conv1 bias (zeros in the border columns)
    w2_ref:  (3, (W+2)*Cmid, 4*W*Cout)  column-banded deconv weights (per window row)
    b2_ref:  (1, 4*W*Cout)              deconv bias tiled over (w, row/col parity)
    o_ref:   (1, H, 4*W*Cout)           lane-dense output slab, compute dtype
    mid_ref: VMEM (_TOP+H+1, (W+2)*Cmid)  padded `mid` scratch (stays on-chip)
    """
    f32 = jnp.float32

    # Zero only the two border rows of the padded `mid` each step (interior
    # rows are fully overwritten below; border *columns* of the interior rows
    # are exact zeros out of the banded matmul).
    zero_row = jnp.zeros((1,) + mid_ref.shape[1:], mid_ref.dtype)
    mid_ref[_TOP - 1:_TOP, :] = zero_row
    mid_ref[_TOP + H:_TOP + H + 1, :] = zero_row

    # ---- stage 1: Conv2d(3x3, pad=1) + ReLU.
    # One matmul per kernel row over the full padded row slab; the result is
    # already the column-padded `mid` row block -> a single lane-dense,
    # sublane-aligned store, no im2col, no relayout.
    acc = jnp.dot(x_ref[0, 0:H, :], w1_ref[0], preferred_element_type=f32)
    acc += jnp.dot(x_ref[0, 1:H + 1, :], w1_ref[1], preferred_element_type=f32)
    acc += jnp.dot(x_ref[0, 2:H + 2, :], w1_ref[2], preferred_element_type=f32)
    mid = jnp.maximum(acc + b1_ref[...], 0.0)
    mid_ref[_TOP:_TOP + H, :] = mid.astype(mid_ref.dtype)

    # ---- stage 2: ConvTranspose2d(4, stride=2, pad=1) + ReLU.
    # The banded weight folds both output row phases and both column parities
    # into the lane dimension, so accumulating over the 3 window rows yields
    # the final lane-dense output rows directly (no phase loop, no concat).
    acc2 = jnp.dot(mid_ref[_TOP - 1:_TOP - 1 + H, :], w2_ref[0],
                   preferred_element_type=f32)
    acc2 += jnp.dot(mid_ref[_TOP:_TOP + H, :], w2_ref[1],
                    preferred_element_type=f32)
    acc2 += jnp.dot(mid_ref[_TOP + 1:_TOP + 1 + H, :], w2_ref[2],
                    preferred_element_type=f32)
    o_ref[0] = jnp.maximum(acc2 + b2_ref[...], 0.0).astype(o_ref.dtype)


def _banded_conv1_weights(w1_hwio, W):
    """Conv2d(3x3, pad=1) HWIO weights -> 3 column-banded matrices.

    band[r] : ((W+2)*Cin, (W+2)*Cmid).  Summing  xpad_rows[h+r, :] @ band[r]
    over r in {0,1,2} gives the column-padded `mid` row h; the border output
    columns (p=0, p=W+1) are all-zero.
    """
    Cin, Cmid = w1_hwio.shape[2], w1_hwio.shape[3]
    Wp = W + 2
    sel = np.zeros((3, Wp, Wp), np.float32)          # [kw, wc_in, p_out]
    for c in range(3):
        for p in range(1, W + 1):                    # interior output cols only
            sel[c, p - 1 + c, p] = 1.0
    band = jnp.einsum('cqp,rcim->rqipm', jnp.asarray(sel), w1_hwio)
    return band.reshape(3, Wp * Cin, Wp * Cmid)


def _banded_deconv_weights(wt, W):
    """ConvTranspose2d(4,s=2,p=1) torch weight (Cmid,Cout,4,4) -> 3 banded mats.

    band[i] : ((W+2)*Cmid, 4*W*Cout).  Summing  padded_mid_rows[m+i, :] @ band[i]
    over i in {0,1,2} gives output row pair m with lanes ordered
    (w, row_parity ph, col_parity pw, cout).
    Tap mapping: kh = 3 + ph - 2*i (valid iff i-ph in {0,1}),
                 kw = 3 + pw - 2*c (valid iff c-pw in {0,1}), wc = w + c.
    """
    Cmid, Cout = wt.shape[0], wt.shape[1]
    Wp = W + 2
    sel_r = np.zeros((3, 2, 4), np.float32)          # [i, ph, kh]
    for i in range(3):
        for ph in range(2):
            if 0 <= i - ph <= 1:
                sel_r[i, ph, 3 + ph - 2 * i] = 1.0
    sel_c = np.zeros((2, 4, Wp, W), np.float32)      # [pw, kw, wc, w]
    for c in range(3):
        for pw in range(2):
            if 0 <= c - pw <= 1:
                kw = 3 + pw - 2 * c
                for w in range(W):
                    sel_c[pw, kw, w + c, w] = 1.0
    band = jnp.einsum('aph,bkqw,mohk->aqmwpbo',
                      jnp.asarray(sel_r), jnp.asarray(sel_c), wt)
    return band.reshape(3, Wp * Cmid, W * 4 * Cout)


@functools.partial(jax.jit, static_argnames=("compute_dtype", "out_dtype"))
def decoder_block_resnet_forward(x_nchw, params, *,
                                 compute_dtype=jnp.bfloat16, out_dtype=None):
    """DecoderBlockResNet(res_blocks_dec=False).forward — NCHW in, NCHW out."""
    N, Cin, H, W = x_nchw.shape
    w1 = params["conv1_w"]                       # (3, 3, Cin, Cmid)  HWIO
    b1 = params["conv1_b"]                       # (Cmid,)
    wt = params["deconv_w"]                      # (Cmid, Cout, 4, 4) torch layout
    bt = params["deconv_b"]                      # (Cout,)
    Cmid, Cout = w1.shape[3], wt.shape[1]
    out_dtype = x_nchw.dtype if out_dtype is None else out_dtype

    # Channel-packed rows, zero-padded once in HBM (the smallest tensor).
    x_rows = jnp.transpose(x_nchw, (0, 2, 3, 1)).reshape(N, H, W * Cin)
    x_pad = jnp.pad(x_rows, ((0, 0), (1, 1), (Cin, Cin))).astype(compute_dtype)

    w1b = _banded_conv1_weights(w1, W).astype(compute_dtype)
    w2b = _banded_deconv_weights(wt, W).astype(compute_dtype)
    b1p = jnp.concatenate([jnp.zeros((Cmid,), jnp.float32),
                           jnp.tile(b1.astype(jnp.float32), W),
                           jnp.zeros((Cmid,), jnp.float32)])[None, :]
    b2p = jnp.tile(bt.astype(jnp.float32), 4 * W)[None, :]

    Kin = (W + 2) * Cin
    Kmid = (W + 2) * Cmid
    Nout = 4 * W * Cout

    kern = functools.partial(_fused_decoder_kernel, H=H)

    raw = pl.pallas_call(
        kern,
        out_shape=jax.ShapeDtypeStruct((N, H, Nout), compute_dtype),
        grid=(N,),
        in_specs=[
            pl.BlockSpec((1, H + 2, Kin), lambda n: (n, 0, 0)),
            pl.BlockSpec((3, Kin, Kmid), lambda n: (0, 0, 0)),
            pl.BlockSpec((1, Kmid), lambda n: (0, 0)),
            pl.BlockSpec((3, Kmid, Nout), lambda n: (0, 0, 0)),
            pl.BlockSpec((1, Nout), lambda n: (0, 0)),
        ],
        out_specs=pl.BlockSpec((1, H, Nout), lambda n: (n, 0, 0)),
        scratch_shapes=[pltpu.VMEM((_TOP + H + 1, Kmid), compute_dtype)],
        compiler_params=pltpu.CompilerParams(
            dimension_semantics=("parallel",),
            vmem_limit_bytes=32 * 1024 * 1024),
    )(x_pad, w1b, b1p, w2b, b2p)

    # raw[n, m, lane] with lane = w*4*Cout + ph*2*Cout + pw*Cout + co
    #   -> NCHW out[n, co, 2m+ph, 2w+pw]
    out = raw.reshape(N, H, W, 2, 2, Cout)
    out = jnp.transpose(out, (0, 5, 1, 3, 2, 4)).reshape(N, Cout, 2 * H, 2 * W)
    return out.astype(out_dtype)


def _reference_forward(x_nchw, params):
    """Pure-JAX reference (lax conv ops) for correctness checking."""
    x = jnp.transpose(x_nchw, (0, 2, 3, 1))
    dn = ("NHWC", "HWIO", "NHWC")
    mid = jax.lax.conv_general_dilated(
        x, params["conv1_w"], window_strides=(1, 1),
        padding=((1, 1), (1, 1)), dimension_numbers=dn)
    mid = jnp.maximum(mid + params["conv1_b"], 0.0)
    wt = params["deconv_w"]
    w_eq = jnp.transpose(wt[:, :, ::-1, ::-1], (2, 3, 0, 1))
    out = jax.lax.conv_general_dilated(
        mid, w_eq, window_strides=(1, 1), padding=((2, 2), (2, 2)),
        lhs_dilation=(2, 2), dimension_numbers=dn)
    out = jnp.maximum(out + params["deconv_b"], 0.0)
    return jnp.transpose(out, (0, 3, 1, 2))


if __name__ == "__main__":
    N, Cin, Cmid, Cout, H, W = 2, 4, 8, 4, 16, 16

    key = jax.random.PRNGKey(0)
    k1, k2, k3, k4, k5 = jax.random.split(key, 5)
    params = {
        "conv1_w": 0.1 * jax.random.normal(k1, (3, 3, Cin, Cmid), jnp.float32),
        "conv1_b": 0.1 * jax.random.normal(k2, (Cmid,), jnp.float32),
        # ConvTranspose2d weight in PyTorch layout: (in_channels, out_channels, kH, kW)
        "deconv_w": 0.1 * jax.random.normal(k3, (Cmid, Cout, 4, 4), jnp.float32),
        "deconv_b": 0.1 * jax.random.normal(k4, (Cout,), jnp.float32),
    }
    x = jax.random.normal(k5, (N, Cin, H, W), jnp.float32)

    ref = jax.block_until_ready(_reference_forward(x, params))

    # f32 compute path: validates the banded-weight / phase mapping exactly.
    out_f32 = jax.block_until_ready(
        decoder_block_resnet_forward(x, params, compute_dtype=jnp.float32))
    assert out_f32.shape == (N, Cout, 2 * H, 2 * W), out_f32.shape
    assert jnp.allclose(out_f32, ref, rtol=2e-4, atol=2e-4), float(
        jnp.max(jnp.abs(out_f32 - ref)))

    # Default bf16 compute path (mid is truncated to bf16 -> looser tolerance).
    out_bf16 = jax.block_until_ready(decoder_block_resnet_forward(x, params))
    assert out_bf16.shape == (N, Cout, 2 * H, 2 * W), out_bf16.shape
    assert jnp.allclose(out_bf16, ref, rtol=5e-2, atol=7.5e-2), float(
        jnp.max(jnp.abs(out_bf16 - ref)))

    print("KERNEL_OK")
</pallas_src>

<mosaic_0001>
module attributes {stable_mosaic.version = 11 : i64} {
  func.func @_fused_decoder_kernel(%arg0: i32, %arg1: memref<1x18x72xf32, #tpu.memory_space<vmem>>, %arg2: memref<3x72x144xf32, #tpu.memory_space<vmem>>, %arg3: memref<1x144xf32, #tpu.memory_space<vmem>>, %arg4: memref<3x144x256xf32, #tpu.memory_space<vmem>>, %arg5: memref<1x256xf32, #tpu.memory_space<vmem>>, %arg6: memref<1x16x256xf32, #tpu.memory_space<vmem>>, %arg7: memref<33x144xf32, #tpu.memory_space<vmem>>) attributes {dimension_semantics = [#tpu.dimension_semantics<parallel>], iteration_bounds = array<i64: 2>, scalar_prefetch = 0 : i64, scratch_operands = 1 : i64, tpu.core_type = #tpu.core_type<tc>, window_params = [{transform_indices = @transform_0, window_bounds = array<i64: 1, 18, 72>}, {pipeline_mode = #tpu.pipeline_mode<synchronous>, transform_indices = @transform_1, window_bounds = array<i64: 3, 72, 144>}, {pipeline_mode = #tpu.pipeline_mode<synchronous>, transform_indices = @transform_2, window_bounds = array<i64: 1, 144>}, {pipeline_mode = #tpu.pipeline_mode<synchronous>, transform_indices = @transform_3, window_bounds = array<i64: 3, 144, 256>}, {pipeline_mode = #tpu.pipeline_mode<synchronous>, transform_indices = @transform_4, window_bounds = array<i64: 1, 256>}, {transform_indices = @transform_5, window_bounds = array<i64: 1, 16, 256>}]} {
    %cst = arith.constant 0.000000e+00 : f32
    %0 = vector.broadcast %cst : f32 to vector<1x144xf32>
    %c15 = arith.constant 15 : index
    %c0 = arith.constant 0 : index
    %1 = vector.load %arg7[%c15, %c0] : memref<33x144xf32, #tpu.memory_space<vmem>>, vector<1x144xf32>
    tpu.vector_store %arg7[%c15, %c0], %0 {strides = array<i32>} : memref<33x144xf32, #tpu.memory_space<vmem>>, vector<1x144xf32>,
    %c32 = arith.constant 32 : index
    %c0_0 = arith.constant 0 : index
    %2 = vector.load %arg7[%c32, %c0_0] : memref<33x144xf32, #tpu.memory_space<vmem>>, vector<1x144xf32>
    tpu.vector_store %arg7[%c32, %c0_0], %0 {strides = array<i32>} : memref<33x144xf32, #tpu.memory_space<vmem>>, vector<1x144xf32>,
    %c0_1 = arith.constant 0 : index
    %c0_2 = arith.constant 0 : index
    %c0_3 = arith.constant 0 : index
    %3 = vector.load %arg1[%c0_1, %c0_2, %c0_3] : memref<1x18x72xf32, #tpu.memory_space<vmem>>, vector<1x16x72xf32>
    %4 = vector.shape_cast %3 : vector<1x16x72xf32> to vector<16x72xf32>
    %c0_4 = arith.constant 0 : index
    %c0_5 = arith.constant 0 : index
    %c0_6 = arith.constant 0 : index
    %5 = vector.load %arg2[%c0_4, %c0_5, %c0_6] : memref<3x72x144xf32, #tpu.memory_space<vmem>>, vector<1x72x144xf32>
    %6 = vector.shape_cast %5 : vector<1x72x144xf32> to vector<72x144xf32>
    %cst_7 = arith.constant dense<0.000000e+00> : vector<16x144xf32>
    %7 = tpu.matmul %4, %6, %cst_7 {dimension_numbers = #tpu.dot_dimension_numbers<[1], [0], [0], [1], [0, 0, 1, 1], [], []>} : vector<16x72xf32>, vector<72x144xf32>, vector<16x144xf32> -> vector<16x144xf32>
    %c0_8 = arith.constant 0 : index
    %c1 = arith.constant 1 : index
    %c0_9 = arith.constant 0 : index
    %8 = vector.load %arg1[%c0_8, %c1, %c0_9] : memref<1x18x72xf32, #tpu.memory_space<vmem>>, vector<1x16x72xf32>
    %9 = vector.shape_cast %8 : vector<1x16x72xf32> to vector<16x72xf32>
    %c1_10 = arith.constant 1 : index
    %c0_11 = arith.constant 0 : index
    %c0_12 = arith.constant 0 : index
    %10 = vector.load %arg2[%c1_10, %c0_11, %c0_12] : memref<3x72x144xf32, #tpu.memory_space<vmem>>, vector<1x72x144xf32>
    %11 = vector.shape_cast %10 : vector<1x72x144xf32> to vector<72x144xf32>
    %cst_13 = arith.constant dense<0.000000e+00> : vector<16x144xf32>
    %12 = tpu.matmul %9, %11, %cst_13 {dimension_numbers = #tpu.dot_dimension_numbers<[1], [0], [0], [1], [0, 0, 1, 1], [], []>} : vector<16x72xf32>, vector<72x144xf32>, vector<16x144xf32> -> vector<16x144xf32>
    %13 = arith.addf %7, %12 : vector<16x144xf32>
    %c0_14 = arith.constant 0 : index
    %c2 = arith.constant 2 : index
    %c0_15 = arith.constant 0 : index
    %14 = vector.load %arg1[%c0_14, %c2, %c0_15] : memref<1x18x72xf32, #tpu.memory_space<vmem>>, vector<1x16x72xf32>
    %15 = vector.shape_cast %14 : vector<1x16x72xf32> to vector<16x72xf32>
    %c2_16 = arith.constant 2 : index
    %c0_17 = arith.constant 0 : index
    %c0_18 = arith.constant 0 : index
    %16 = vector.load %arg2[%c2_16, %c0_17, %c0_18] : memref<3x72x144xf32, #tpu.memory_space<vmem>>, vector<1x72x144xf32>
    %17 = vector.shape_cast %16 : vector<1x72x144xf32> to vector<72x144xf32>
    %cst_19 = arith.constant dense<0.000000e+00> : vector<16x144xf32>
    %18 = tpu.matmul %15, %17, %cst_19 {dimension_numbers = #tpu.dot_dimension_numbers<[1], [0], [0], [1], [0, 0, 1, 1], [], []>} : vector<16x72xf32>, vector<72x144xf32>, vector<16x144xf32> -> vector<16x144xf32>
    %19 = arith.addf %13, %18 : vector<16x144xf32>
    %c0_20 = arith.constant 0 : index
    %c0_21 = arith.constant 0 : index
    %20 = vector.load %arg3[%c0_20, %c0_21] : memref<1x144xf32, #tpu.memory_space<vmem>>, vector<1x144xf32>
    %21 = vector.broadcast %20 : vector<1x144xf32> to vector<16x144xf32>
    %22 = arith.addf %19, %21 : vector<16x144xf32>
    %cst_22 = arith.constant 0.000000e+00 : f32
    %23 = vector.broadcast %cst_22 : f32 to vector<16x144xf32>
    %24 = arith.maximumf %22, %23 : vector<16x144xf32>
    %c16 = arith.constant 16 : index
    %c0_23 = arith.constant 0 : index
    %25 = vector.load %arg7[%c16, %c0_23] : memref<33x144xf32, #tpu.memory_space<vmem>>, vector<16x144xf32>
    tpu.vector_store %arg7[%c16, %c0_23], %24 {strides = array<i32>} : memref<33x144xf32, #tpu.memory_space<vmem>>, vector<16x144xf32>,
    %c15_24 = arith.constant 15 : index
    %c0_25 = arith.constant 0 : index
    %26 = vector.load %arg7[%c15_24, %c0_25] : memref<33x144xf32, #tpu.memory_space<vmem>>, vector<16x144xf32>
    %c0_26 = arith.constant 0 : index
    %c0_27 = arith.constant 0 : index
    %c0_28 = arith.constant 0 : index
    %27 = vector.load %arg4[%c0_26, %c0_27, %c0_28] : memref<3x144x256xf32, #tpu.memory_space<vmem>>, vector<1x144x256xf32>
    %28 = vector.shape_cast %27 : vector<1x144x256xf32> to vector<144x256xf32>
    %cst_29 = arith.constant dense<0.000000e+00> : vector<16x256xf32>
    %29 = tpu.matmul %26, %28, %cst_29 {dimension_numbers = #tpu.dot_dimension_numbers<[1], [0], [0], [1], [0, 0, 1, 1], [], []>} : vector<16x144xf32>, vector<144x256xf32>, vector<16x256xf32> -> vector<16x256xf32>
    %c16_30 = arith.constant 16 : index
    %c0_31 = arith.constant 0 : index
    %30 = vector.load %arg7[%c16_30, %c0_31] : memref<33x144xf32, #tpu.memory_space<vmem>>, vector<16x144xf32>
    %c1_32 = arith.constant 1 : index
    %c0_33 = arith.constant 0 : index
    %c0_34 = arith.constant 0 : index
    %31 = vector.load %arg4[%c1_32, %c0_33, %c0_34] : memref<3x144x256xf32, #tpu.memory_space<vmem>>, vector<1x144x256xf32>
    %32 = vector.shape_cast %31 : vector<1x144x256xf32> to vector<144x256xf32>
    %cst_35 = arith.constant dense<0.000000e+00> : vector<16x256xf32>
    %33 = tpu.matmul %30, %32, %cst_35 {dimension_numbers = #tpu.dot_dimension_numbers<[1], [0], [0], [1], [0, 0, 1, 1], [], []>} : vector<16x144xf32>, vector<144x256xf32>, vector<16x256xf32> -> vector<16x256xf32>
    %34 = arith.addf %29, %33 : vector<16x256xf32>
    %c17 = arith.constant 17 : index
    %c0_36 = arith.constant 0 : index
    %35 = vector.load %arg7[%c17, %c0_36] : memref<33x144xf32, #tpu.memory_space<vmem>>, vector<16x144xf32>
    %c2_37 = arith.constant 2 : index
    %c0_38 = arith.constant 0 : index
    %c0_39 = arith.constant 0 : index
    %36 = vector.load %arg4[%c2_37, %c0_38, %c0_39] : memref<3x144x256xf32, #tpu.memory_space<vmem>>, vector<1x144x256xf32>
    %37 = vector.shape_cast %36 : vector<1x144x256xf32> to vector<144x256xf32>
    %cst_40 = arith.constant dense<0.000000e+00> : vector<16x256xf32>
    %38 = tpu.matmul %35, %37, %cst_40 {dimension_numbers = #tpu.dot_dimension_numbers<[1], [0], [0], [1], [0, 0, 1, 1], [], []>} : vector<16x144xf32>, vector<144x256xf32>, vector<16x256xf32> -> vector<16x256xf32>
    %39 = arith.addf %34, %38 : vector<16x256xf32>
    %c0_41 = arith.constant 0 : index
    %c0_42 = arith.constant 0 : index
    %40 = vector.load %arg5[%c0_41, %c0_42] : memref<1x256xf32, #tpu.memory_space<vmem>>, vector<1x256xf32>
    %41 = vector.broadcast %40 : vector<1x256xf32> to vector<16x256xf32>
    %42 = arith.addf %39, %41 : vector<16x256xf32>
    %cst_43 = arith.constant 0.000000e+00 : f32
    %43 = vector.broadcast %cst_43 : f32 to vector<16x256xf32>
    %44 = arith.maximumf %42, %43 : vector<16x256xf32>
    %c0_44 = arith.constant 0 : index
    %c0_45 = arith.constant 0 : index
    %c0_46 = arith.constant 0 : index
    %45 = vector.load %arg6[%c0_44, %c0_45, %c0_46] : memref<1x16x256xf32, #tpu.memory_space<vmem>>, vector<1x16x256xf32>
    %46 = vector.shape_cast %45 : vector<1x16x256xf32> to vector<16x256xf32>
    %47 = vector.shape_cast %44 : vector<16x256xf32> to vector<1x16x256xf32>
    tpu.vector_store %arg6[%c0_44, %c0_45, %c0_46], %47 {strides = array<i32>} : memref<1x16x256xf32, #tpu.memory_space<vmem>>, vector<1x16x256xf32>,
    return
  }
  func.func @transform_0(%arg0: i32) -> (i32, i32, i32) {
    %c0_i32 = arith.constant 0 : i32
    %c0_i32_0 = arith.constant 0 : i32
    %c0_i32_1 = arith.constant 0 : i32
    return %arg0, %c0_i32, %c0_i32_0 : i32, i32, i32
  }
  func.func @transform_1(%arg0: i32) -> (i32, i32, i32) {
    %c0_i32 = arith.constant 0 : i32
    %c0_i32_0 = arith.constant 0 : i32
    %c0_i32_1 = arith.constant 0 : i32
    %c0_i32_2 = arith.constant 0 : i32
    return %c0_i32, %c0_i32_0, %c0_i32_1 : i32, i32, i32
  }
  func.func @transform_2(%arg0: i32) -> (i32, i32) {
    %c0_i32 = arith.constant 0 : i32
    %c0_i32_0 = arith.constant 0 : i32
    %c0_i32_1 = arith.constant 0 : i32
    return %c0_i32, %c0_i32_0 : i32, i32
  }
  func.func @transform_3(%arg0: i32) -> (i32, i32, i32) {
    %c0_i32 = arith.constant 0 : i32
    %c0_i32_0 = arith.constant 0 : i32
    %c0_i32_1 = arith.constant 0 : i32
    %c0_i32_2 = arith.constant 0 : i32
    return %c0_i32, %c0_i32_0, %c0_i32_1 : i32, i32, i32
  }
  func.func @transform_4(%arg0: i32) -> (i32, i32) {
    %c0_i32 = arith.constant 0 : i32
    %c0_i32_0 = arith.constant 0 : i32
    %c0_i32_1 = arith.constant 0 : i32
    return %c0_i32, %c0_i32_0 : i32, i32
  }
  func.func @transform_5(%arg0: i32) -> (i32, i32, i32) {
    %c0_i32 = arith.constant 0 : i32
    %c0_i32_0 = arith.constant 0 : i32
    %c0_i32_1 = arith.constant 0 : i32
    return %arg0, %c0_i32, %c0_i32_0 : i32, i32, i32
  }
}

</mosaic_0001>

<bundles_post_ra>
// kernel: tile.18
= control target key start
LH: loop header
LB: loop body
LE: loop exit
PB: predicated region body
PF: predicated region fallthrough
CT: control target
= control target key end

     0   :  { %s64_s0 = inlined_call_operand.vmem [shape: f32[4], index: 0, kind: input, shape index: {}]   ;;  %s65_s1 = inlined_call_operand.vmem [shape: f32[64,4], index: 1, kind: output, shape index: {}]  }
   0x1   :  { %v4_v0 = vld [vmem:[%s64_s0] ss:$0 sm:$0xff] }
   0x2   :  { %5 = vst [vmem:[%s65_s1] sm:$0xff] %v4_v0  ;;  %20 = vst [vmem:[%s65_s1 + $0x8] sm:$0xff] %v4_v0 }
   0x3   :  { %21 = vst [vmem:[%s65_s1 + $0x10] sm:$0xff] %v4_v0  ;;  %22 = vst [vmem:[%s65_s1 + $0x18] sm:$0xff] %v4_v0 }
   0x4   :  { %23 = vst [vmem:[%s65_s1 + $0x20] sm:$0xff] %v4_v0  ;;  %24 = vst [vmem:[%s65_s1 + $0x28] sm:$0xff] %v4_v0 }
   0x5   :  { %25 = vst [vmem:[%s65_s1 + $0x30] sm:$0xff] %v4_v0  ;;  %26 = vst [vmem:[%s65_s1 + $0x38] sm:$0xff] %v4_v0 }

// kernel: tile.19
= control target key start
LH: loop header
LB: loop body
LE: loop exit
PB: predicated region body
PF: predicated region fallthrough
CT: control target
= control target key end

     0   :  { %vm5_vm0 = vcmask 1041409   ;;  %s425_s14 = smov 124   ;;  %s426_s21 = smov 116   ;;  %vm7_vm1 = vcmask 31744   ;;  %vm17_vm2 = vcmask 1048544   ;;  %vm27_vm3 = vcmask 1015744   ;;  %s696_s0 = inlined_call_operand.vmem [shape: f32[64,4], index: 0, kind: input, shape index: {}]   ;;  %s697_s1 = inlined_call_operand.vmem [shape: f32[1,256], index: 1, kind: output, shape index: {}]  }
   0x1   :  { %v331_v0 = vld [vmem:[%s696_s0 + $0x1f] sm:$0x1]   ;;  %v335_v3 = vld [vmem:[%s696_s0 + $0x1d] sm:$0x1]   ;;  %v333_v6 = vld [vmem:[%s696_s0 + $0x1e] sm:$0x1]  }
   0x2   :  { %v332_v1 = vld [vmem:[%s696_s0 + $0x3e] sm:$0x2]   ;;  %v336_v4 = vld [vmem:[%s696_s0 + $0x3c] sm:$0x2]   ;;  %v334_v7 = vld [vmem:[%s696_s0 + $0x3d] sm:$0x2]  }
   0x3   :  { %v14_v2 = vsel %vm5_vm0, %v332_v1, %v331_v0  ;;  %v34_v5 = vsel %vm5_vm0, %v336_v4, %v335_v3  ;;  %v337_v8 = vld [vmem:[%s696_s0 + $0x1c] sm:$0x1]   ;;  %v24_v9 = vsel %vm5_vm0, %v334_v7, %v333_v6  ;;  %v339_v12 = vld [vmem:[%s696_s0 + $0x1b] sm:$0x1]   ;;  %v341_v14 = vld [vmem:[%s696_s0 + $0x1a] sm:$0x1]  }
   0x4   :  { %15 = vrot.lane.b32.xlu0 %v14_v2, %s425_s14  ;;  %35 = vrot.lane.b32.xlu1 %v34_v5, %s426_s21  ;;  %v338_v10 = vld [vmem:[%s696_s0 + $0x3b] sm:$0x2]   ;;  %v340_v13 = vld [vmem:[%s696_s0 + $0x3a] sm:$0x2]   ;;  %s427_s3 = smov 120   ;;  %s428_s4 = smov 112  }
   0x5   :  { %v44_v11 = vsel %vm5_vm0, %v338_v10, %v337_v8  ;;  %v342_v15 = vld [vmem:[%s696_s0 + $0x39] sm:$0x2]   ;;  %v54_v16 = vsel %vm5_vm0, %v340_v13, %v339_v12  ;;  %v343_v18 = vld [vmem:[%s696_s0 + $0x19] sm:$0x1]   ;;  %v345_v20 = vld [vmem:[%s696_s0 + $0x18] sm:$0x1]  }
   0x6   :  { %v64_v17 = vsel %vm5_vm0, %v342_v15, %v341_v14  ;;  %v344_v19 = vld [vmem:[%s696_s0 + $0x38] sm:$0x2]   ;;  %v346_v21 = vld [vmem:[%s696_s0 + $0x37] sm:$0x2]   ;;  %s429_s13 = smov 108   ;;  %s430_s14 = smov 104  }
   0x7   :  { %v74_v22 = vsel %vm5_vm0, %v344_v19, %v343_v18  ;;  %v84_v23 = vsel %vm5_vm0, %v346_v21, %v345_v20  ;;  %v347_v24 = vld [vmem:[%s696_s0 + $0x17] sm:$0x1]   ;;  %v349_v26 = vld [vmem:[%s696_s0 + $0x16] sm:$0x1]   ;;  %s431_s23 = smov 100   ;;  %s432_s24 = smov 96  }
   0x8   :  { %25 = vrot.lane.b32.xlu0 %v24_v9, %s427_s3  ;;  %45 = vrot.lane.b32.xlu1 %v44_v11, %s428_s4  ;;  %v348_v25 = vld [vmem:[%s696_s0 + $0x36] sm:$0x2]   ;;  %v350_v27 = vld [vmem:[%s696_s0 + $0x35] sm:$0x2]   ;;  %s433_s4 = smov 92   ;;  %s434_s5 = smov 88  }
   0x9   :  { %v94_v28 = vsel %vm5_vm0, %v348_v25, %v347_v24  ;;  %v104_v29 = vsel %vm5_vm0, %v350_v27, %v349_v26  ;;  %v351_v30 = vld [vmem:[%s696_s0 + $0x15] sm:$0x1]   ;;  %v353_v32 = vld [vmem:[%s696_s0 + $0x14] sm:$0x1]   ;;  %v355_v36 = vld [vmem:[%s696_s0 + $0x13] sm:$0x1]  }
   0xa   :  { %v352_v31 = vld [vmem:[%s696_s0 + $0x34] sm:$0x2]   ;;  %v354_v33 = vld [vmem:[%s696_s0 + $0x33] sm:$0x2]   ;;  %v356_v37 = vld [vmem:[%s696_s0 + $0x32] sm:$0x2]  }
   0xb   :  { %v114_v34 = vsel %vm5_vm0, %v352_v31, %v351_v30  ;;  %v124_v35 = vsel %vm5_vm0, %v354_v33, %v353_v32  ;;  %v357_v38 = vld [vmem:[%s696_s0 + $0x12] sm:$0x1]   ;;  %s436_s15 = smov 80   ;;  %v134_v40 = vsel %vm5_vm0, %v356_v37, %v355_v36  ;;  %v359_v42 = vld [vmem:[%s696_s0 + $0x11] sm:$0x1]   ;;  %s438_s29 = smov 72  }
   0xc   :  { %55 = vrot.lane.b32.xlu0 %v54_v16, %s429_s13  ;;  %65 = vrot.lane.b32.xlu1 %v64_v17, %s430_s14  ;;  %v358_v39 = vld [vmem:[%s696_s0 + $0x31] sm:$0x2]   ;;  %s435_s14 = smov 84   ;;  %v360_v43 = vld [vmem:[%s696_s0 + $0x30] sm:$0x2]   ;;  %s439_s9 = smov 68  }
   0xd   :  { %v144_v41 = vsel %vm5_vm0, %v358_v39, %v357_v38  ;;  %v361_v44 = vld [vmem:[%s696_s0 + $0x10] sm:$0x1]   ;;  %v2_v46 = vld [vmem:[%s696_s0] sm:$0x1]   ;;  %v154_v48 = vsel %vm5_vm0, %v360_v43, %v359_v42  ;;  %v363_v51 = vld [vmem:[%s696_s0 + $0xf] sm:$0x1]  }
   0xe   :  { %v362_v45 = vld [vmem:[%s696_s0 + $0x2f] sm:$0x2]   ;;  %v330_v47 = vld [vmem:[%s696_s0 + $0x1f] sm:$0x2]   ;;  %v364_v52 = vld [vmem:[%s696_s0 + $0x2e] sm:$0x2]  }
   0xf   :  { %v6_v49 = vsel %vm5_vm0, %v330_v47, %v2_v46  ;;  %v164_v50 = vsel %vm5_vm0, %v362_v45, %v361_v44  ;;  %v365_v53 = vld [vmem:[%s696_s0 + $0xe] sm:$0x1]   ;;  %s440_s10 = smov 64   ;;  %v174_v55 = vsel %vm5_vm0, %v364_v52, %v363_v51  ;;  %v367_v57 = vld [vmem:[%s696_s0 + $0xd] sm:$0x1]   ;;  %s441_s19 = smov 60  }
  0x10   :  { %75 = vrot.lane.b32.xlu0 %v74_v22, %s431_s23  ;;  %85 = vrot.lane.b32.xlu1 %v84_v23, %s432_s24  ;;  %s437_s24 = smov 76   ;;  %8 = vst.msk [vmem:[#allocation0] ss:$8 sm:$0x3] %vm7_vm1, %v6_v49   ;;  %v366_v54 = vld [vmem:[%s696_s0 + $0x2d] sm:$0x2]  }
  0x11   :  { %v184_v56 = vsel %vm5_vm0, %v366_v54, %v365_v53  ;;  %v368_v58 = vld [vmem:[%s696_s0 + $0x2c] sm:$0x2]   ;;  %v369_v59 = vld [vmem:[%s696_s0 + $0xc] sm:$0x1]   ;;  %s442_s20 = smov 56   ;;  %s444_s30 = smov 48  }
  0x12   :  { %v370_v60 = vld [vmem:[%s696_s0 + $0x2b] sm:$0x2]   ;;  %v194_v61 = vsel %vm5_vm0, %v368_v58, %v367_v57  ;;  %v371_v63 = vld [vmem:[%s696_s0 + $0xb] sm:$0x1]   ;;  %v373_v1 = vld [vmem:[%s696_s0 + $0xa] sm:$0x1]  }
  0x13   :  { %v204_v62 = vsel %vm5_vm0, %v370_v60, %v369_v59  ;;  %v372_v0 = vld [vmem:[%s696_s0 + $0x2a] sm:$0x2]   ;;  %v374_v2 = vld [vmem:[%s696_s0 + $0x29] sm:$0x2]   ;;  %v375_v5 = vld [vmem:[%s696_s0 + $0x9] sm:$0x1]  }
  0x14   :  { %95 = vrot.lane.b32.xlu0 %v94_v28, %s433_s4  ;;  %105 = vrot.lane.b32.xlu1 %v104_v29, %s434_s5  ;;  %v214_v3 = vsel %vm5_vm0, %v372_v0, %v371_v63  ;;  %v224_v4 = vsel %vm5_vm0, %v374_v2, %v373_v1  ;;  %v376_v6 = vld [vmem:[%s696_s0 + $0x28] sm:$0x2]   ;;  %v377_v7 = vld [vmem:[%s696_s0 + $0x8] sm:$0x1]   ;;  %s446_s11 = smov 40   ;;  %s448_s21 = smov 32  }
  0x15   :  { %v378_v8 = vld [vmem:[%s696_s0 + $0x27] sm:$0x2]   ;;  %v234_v9 = vsel %vm5_vm0, %v376_v6, %v375_v5  ;;  %v379_v11 = vld [vmem:[%s696_s0 + $0x7] sm:$0x1]   ;;  %v381_v13 = vld [vmem:[%s696_s0 + $0x6] sm:$0x1]  }
  0x16   :  { %v244_v10 = vsel %vm5_vm0, %v378_v8, %v377_v7  ;;  %v380_v12 = vld [vmem:[%s696_s0 + $0x26] sm:$0x2]   ;;  %v382_v14 = vld [vmem:[%s696_s0 + $0x25] sm:$0x2]   ;;  %v383_v17 = vld [vmem:[%s696_s0 + $0x5] sm:$0x1]  }
  0x17   :  { %v254_v15 = vsel %vm5_vm0, %v380_v12, %v379_v11  ;;  %v264_v16 = vsel %vm5_vm0, %v382_v14, %v381_v13  ;;  %v384_v18 = vld [vmem:[%s696_s0 + $0x24] sm:$0x2]   ;;  %v385_v19 = vld [vmem:[%s696_s0 + $0x4] sm:$0x1]   ;;  %s450_s2 = smov 24   ;;  %s452_s12 = smov 16  }
  0x18   :  { %115 = vrot.lane.b32.xlu0 %v114_v34, %s435_s14  ;;  %125 = vrot.lane.b32.xlu1 %v124_v35, %s436_s15  ;;  %v386_v20 = vld [vmem:[%s696_s0 + $0x23] sm:$0x2]   ;;  %v274_v21 = vsel %vm5_vm0, %v384_v18, %v383_v17  ;;  %v387_v23 = vld [vmem:[%s696_s0 + $0x3] sm:$0x1]   ;;  %s454_s17 = smov 8   ;;  %s455_s18 = smov 4  }
  0x19   :  { %v284_v22 = vsel %vm5_vm0, %v386_v20, %v385_v19  ;;  %v388_v24 = vld [vmem:[%s696_s0 + $0x22] sm:$0x2]   ;;  %v389_v25 = vld [vmem:[%s696_s0 + $0x2] sm:$0x1]   ;;  %v391_v29 = vld [vmem:[%s696_s0 + $0x1] sm:$0x1]  }
  0x1a   :  { %v390_v26 = vld [vmem:[%s696_s0 + $0x21] sm:$0x2]   ;;  %v294_v27 = vsel %vm5_vm0, %v388_v24, %v387_v23  ;;  %v392_v30 = vld [vmem:[%s696_s0 + $0x20] sm:$0x2]   ;;  %s453_s0 = smov 12   ;;  %vm37_vm4 = vcmask 982944  }
  0x1b   :  { %v304_v28 = vsel %vm5_vm0, %v390_v26, %v389_v25  ;;  %v314_v31 = vsel %vm5_vm0, %v392_v30, %v391_v29  ;;  %vm47_vm5 = vcmask 950144   ;;  %vm57_vm6 = vcmask 917344  }
  0x1c   :  { %135 = vrot.lane.b32.xlu0 %v134_v40, %s437_s24  ;;  %145 = vrot.lane.b32.xlu1 %v144_v41, %s438_s29  ;;  %s443_s29 = smov 52   ;;  %vm67_vm7 = vcmask 884544   ;;  %vm77_vm8 = vcmask 851744   ;;  %vm87_vm9 = vcmask 818944   ;;  %vm97_vm10 = vcmask 786144  }
  0x1d   :  { %vm107_vm11 = vcmask 753344   ;;  %vm117_vm12 = vcmask 720544   ;;  %vm127_vm13 = vcmask 687744   ;;  %vm137_vm14 = vcmask 654944  }
  0x1e   :  { %vm147_vm15 = vcmask 622144   ;;  %vm157_vm0 = vcmask 589344   ;;  %vm167_vm1 = vcmask 556544  }
  0x20   :  { %155 = vrot.lane.b32.xlu0 %v154_v48, %s439_s9  ;;  %165 = vrot.lane.b32.xlu1 %v164_v50, %s440_s10  ;;  %s445_s10 = smov 44  }
  0x24   :  { %175 = vrot.lane.b32.xlu0 %v174_v55, %s441_s19  ;;  %185 = vrot.lane.b32.xlu1 %v184_v56, %s442_s20  ;;  %s447_s20 = smov 36  }
  0x28   :  { %195 = vrot.lane.b32.xlu0 %v194_v61, %s443_s29  ;;  %205 = vrot.lane.b32.xlu1 %v204_v62, %s444_s30  ;;  %s449_s30 = smov 28  }
  0x2c   :  { %215 = vrot.lane.b32.xlu0 %v214_v3, %s445_s10  ;;  %225 = vrot.lane.b32.xlu1 %v224_v4, %s446_s11  ;;  %s451_s11 = smov 20  }
  0x30   :  { %235 = vrot.lane.b32.xlu0 %v234_v9, %s447_s20  ;;  %245 = vrot.lane.b32.xlu1 %v244_v10, %s448_s21 }
  0x34   :  { %255 = vrot.lane.b32.xlu0 %v254_v15, %s449_s30  ;;  %265 = vrot.lane.b32.xlu1 %v264_v16, %s450_s2 }
  0x38   :  { %275 = vrot.lane.b32.xlu0 %v274_v21, %s451_s11  ;;  %285 = vrot.lane.b32.xlu1 %v284_v22, %s452_s12 }
  0x3c   :  { %295 = vrot.lane.b32.xlu0 %v294_v27, %s453_s0  ;;  %305 = vrot.lane.b32.xlu1 %v304_v28, %s454_s17 }
  0x40   :  { %315 = vrot.lane.b32.xlu0 %v314_v31, %s455_s18 }
  0x76   :  { %v16_v32 = vpop.permute.xlu0 %15   ;;  %v36_v33 = vpop.permute.xlu1 %35  }
  0x77   :  { %18 = vst.msk [vmem:[#allocation0] ss:$8 sm:$0x3] %vm17_vm2, %v16_v32   ;;  %vm177_vm2 = vcmask 523744  }
  0x7a   :  { %v26_v34 = vpop.permute.xlu0 %25   ;;  %v46_v35 = vpop.permute.xlu1 %45  }
  0x7b   :  { %28 = vst.msk [vmem:[#allocation0] ss:$8 sm:$0x3] %vm27_vm3, %v26_v34   ;;  %vm187_vm3 = vcmask 490944  }
  0x7c   :  { %38 = vst.msk [vmem:[#allocation0] ss:$8 sm:$0x3] %vm37_vm4, %v36_v33   ;;  %vm197_vm4 = vcmask 458144  }
  0x7d   :  { %48 = vst.msk [vmem:[#allocation0] ss:$8 sm:$0x3] %vm47_vm5, %v46_v35   ;;  %vm207_vm5 = vcmask 425344  }
  0x7e   :  { %v56_v36 = vpop.permute.xlu0 %55   ;;  %v66_v37 = vpop.permute.xlu1 %65  }
  0x7f   :  { %58 = vst.msk [vmem:[#allocation0] ss:$8 sm:$0x3] %vm57_vm6, %v56_v36   ;;  %vm217_vm6 = vcmask 392544  }
  0x80   :  { %68 = vst.msk [vmem:[#allocation0] ss:$8 sm:$0x3] %vm67_vm7, %v66_v37   ;;  %vm227_vm7 = vcmask 359744  }
  0x82   :  { %v76_v38 = vpop.permute.xlu0 %75   ;;  %v86_v39 = vpop.permute.xlu1 %85  }
  0x83   :  { %78 = vst.msk [vmem:[#allocation0] ss:$8 sm:$0x3] %vm77_vm8, %v76_v38   ;;  %vm237_vm8 = vcmask 326944  }
  0x84   :  { %88 = vst.msk [vmem:[#allocation0] ss:$8 sm:$0x3] %vm87_vm9, %v86_v39   ;;  %vm247_vm9 = vcmask 294144  }
  0x86   :  { %v96_v40 = vpop.permute.xlu0 %95   ;;  %v106_v41 = vpop.permute.xlu1 %105  }
  0x87   :  { %98 = vst.msk [vmem:[#allocation0] ss:$8 sm:$0x3] %vm97_vm10, %v96_v40   ;;  %vm257_vm10 = vcmask 261344  }
  0x88   :  { %108 = vst.msk [vmem:[#allocation0] ss:$8 sm:$0x3] %vm107_vm11, %v106_v41   ;;  %vm267_vm11 = vcmask 228544  }
  0x8a   :  { %v116_v42 = vpop.permute.xlu0 %115   ;;  %v126_v43 = vpop.permute.xlu1 %125  }
  0x8b   :  { %118 = vst.msk [vmem:[#allocation0] ss:$8 sm:$0x3] %vm117_vm12, %v116_v42   ;;  %vm277_vm12 = vcmask 195744  }
  0x8c   :  { %128 = vst.msk [vmem:[#allocation0] ss:$8 sm:$0x3] %vm127_vm13, %v126_v43   ;;  %vm287_vm13 = vcmask 162944  }
  0x8e   :  { %v136_v44 = vpop.permute.xlu0 %135   ;;  %v146_v45 = vpop.permute.xlu1 %145  }
  0x8f   :  { %138 = vst.msk [vmem:[#allocation0] ss:$8 sm:$0x3] %vm137_vm14, %v136_v44   ;;  %vm297_vm14 = vcmask 130144  }
  0x90   :  { %148 = vst.msk [vmem:[#allocation0] ss:$8 sm:$0x3] %vm147_vm15, %v146_v45   ;;  %vm307_vm15 = vcmask 97344  }
  0x92   :  { %v156_v46 = vpop.permute.xlu0 %155   ;;  %v166_v47 = vpop.permute.xlu1 %165  }
  0x93   :  { %158 = vst.msk [vmem:[#allocation0] ss:$8 sm:$0x3] %vm157_vm0, %v156_v46   ;;  %vm317_vm0 = vcmask 64544  }
  0x94   :  { %168 = vst.msk [vmem:[#allocation0] ss:$8 sm:$0x3] %vm167_vm1, %v166_v47  }
  0x96   :  { %v176_v48 = vpop.permute.xlu0 %175   ;;  %v186_v49 = vpop.permute.xlu1 %185  }
  0x97   :  { %178 = vst.msk [vmem:[#allocation0] ss:$8 sm:$0x3] %vm177_vm2, %v176_v48  }
  0x98   :  { %188 = vst.msk [vmem:[#allocation0] ss:$8 sm:$0x3] %vm187_vm3, %v186_v49  }
  0x9a   :  { %v196_v50 = vpop.permute.xlu0 %195   ;;  %v206_v51 = vpop.permute.xlu1 %205  }
  0x9b   :  { %198 = vst.msk [vmem:[#allocation0] ss:$8 sm:$0x3] %vm197_vm4, %v196_v50  }
  0x9c   :  { %208 = vst.msk [vmem:[#allocation0] ss:$8 sm:$0x3] %vm207_vm5, %v206_v51  }
  0x9e   :  { %v216_v52 = vpop.permute.xlu0 %215   ;;  %v226_v53 = vpop.permute.xlu1 %225  }
  0x9f   :  { %218 = vst.msk [vmem:[#allocation0] ss:$8 sm:$0x3] %vm217_vm6, %v216_v52  }
  0xa0   :  { %228 = vst.msk [vmem:[#allocation0] ss:$8 sm:$0x3] %vm227_vm7, %v226_v53  }
  0xa2   :  { %v236_v54 = vpop.permute.xlu0 %235   ;;  %v246_v55 = vpop.permute.xlu1 %245  }
  0xa3   :  { %238 = vst.msk [vmem:[#allocation0] ss:$8 sm:$0x3] %vm237_vm8, %v236_v54  }
  0xa4   :  { %248 = vst.msk [vmem:[#allocation0] ss:$8 sm:$0x3] %vm247_vm9, %v246_v55  }
  0xa6   :  { %v256_v56 = vpop.permute.xlu0 %255   ;;  %v266_v57 = vpop.permute.xlu1 %265  }
  0xa7   :  { %258 = vst.msk [vmem:[#allocation0] ss:$8 sm:$0x3] %vm257_vm10, %v256_v56  }
  0xa8   :  { %268 = vst.msk [vmem:[#allocation0] ss:$8 sm:$0x3] %vm267_vm11, %v266_v57  }
  0xaa   :  { %v276_v58 = vpop.permute.xlu0 %275   ;;  %v286_v59 = vpop.permute.xlu1 %285  }
  0xab   :  { %278 = vst.msk [vmem:[#allocation0] ss:$8 sm:$0x3] %vm277_vm12, %v276_v58  }
  0xac   :  { %288 = vst.msk [vmem:[#allocation0] ss:$8 sm:$0x3] %vm287_vm13, %v286_v59  }
  0xae   :  { %v296_v60 = vpop.permute.xlu0 %295   ;;  %v306_v61 = vpop.permute.xlu1 %305  }
  0xaf   :  { %298 = vst.msk [vmem:[#allocation0] ss:$8 sm:$0x3] %vm297_vm14, %v296_v60  }
  0xb0   :  { %308 = vst.msk [vmem:[#allocation0] ss:$8 sm:$0x3] %vm307_vm15, %v306_v61  }
  0xb2   :  { %v316_v62 = vpop.permute.xlu0 %315  }
  0xb3   :  { %318 = vst.msk [vmem:[#allocation0] ss:$8 sm:$0x3] %vm317_vm0, %v316_v62  }
  0xba   :  { %v322_v63 = vld [vmem:[#allocation0] sm:$0x1]  ;;  %v326_v0 = vld [vmem:[#allocation0 + $0x8] sm:$0x1] }
  0xbb   :  { %324 = vst [vmem:[%s697_s1] sm:$0x1] %v322_v63  ;;  %393 = vst [vmem:[%s697_s1 + $0x1] sm:$0x1] %v326_v0 }

// kernel: tile.13
= control target key start
LH: loop header
LB: loop body
LE: loop exit
PB: predicated region body
PF: predicated region fallthrough
CT: control target
= control target key end

     0   :  { %s28_s0 = inlined_call_operand.vmem [shape: f32[8], index: 0, kind: input, shape index: {}]   ;;  %s29_s1 = inlined_call_operand.vmem [shape: f32[16,8], index: 1, kind: output, shape index: {}]  }
   0x1   :  { %v4_v0 = vld [vmem:[%s28_s0] ss:$0 sm:$0xff] }
   0x2   :  { %5 = vst [vmem:[%s29_s1] sm:$0xff] %v4_v0  ;;  %8 = vst [vmem:[%s29_s1 + $0x8] sm:$0xff] %v4_v0 }

// kernel: tile.14
= control target key start
LH: loop header
LB: loop body
LE: loop exit
PB: predicated region body
PF: predicated region fallthrough
CT: control target
= control target key end

     0   :  { %s131_s10 = smov 120   ;;  %s132_s11 = smov 104   ;;  %vm3_vm0 = vcmask 64512   ;;  %vm9_vm1 = vcmask 1048512   ;;  %vm15_vm2 = vcmask 982912   ;;  %vm21_vm3 = vcmask 917312   ;;  %s207_s0 = inlined_call_operand.vmem [shape: f32[16,8], index: 0, kind: input, shape index: {}]   ;;  %s208_s1 = inlined_call_operand.vmem [shape: f32[128], index: 1, kind: output, shape index: {}]  }
   0x1   :  { %v101_v0 = vld [vmem:[%s207_s0 + $0xf] sm:$0x1]   ;;  %v103_v1 = vld [vmem:[%s207_s0 + $0xd] sm:$0x1]   ;;  %v102_v2 = vld [vmem:[%s207_s0 + $0xe] sm:$0x1]  }
   0x2   :  { %7 = vrot.lane.b32.xlu0 %v101_v0, %s131_s10  ;;  %19 = vrot.lane.b32.xlu1 %v103_v1, %s132_s11  ;;  %v104_v3 = vld [vmem:[%s207_s0 + $0xc] sm:$0x1]   ;;  %s133_s16 = smov 112   ;;  %s134_s17 = smov 96   ;;  %v105_v4 = vld [vmem:[%s207_s0 + $0xb] sm:$0x1]  }
   0x3   :  { %v106_v5 = vld [vmem:[%s207_s0 + $0xa] sm:$0x1]   ;;  %v2_v6 = vld [vmem:[%s207_s0] sm:$0x1]   ;;  %s135_s24 = smov 88   ;;  %s136_s25 = smov 80  }
   0x4   :  { %4 = vst.msk [vmem:[#allocation0] sm:$0x1] %vm3_vm0, %v2_v6   ;;  %v107_v7 = vld [vmem:[%s207_s0 + $0x9] sm:$0x1]   ;;  %v108_v8 = vld [vmem:[%s207_s0 + $0x8] sm:$0x1]  }
   0x5   :  { %s137_s30 = smov 72   ;;  %s138_s2 = smov 64   ;;  %v109_v9 = vld [vmem:[%s207_s0 + $0x7] sm:$0x1]   ;;  %v110_v10 = vld [vmem:[%s207_s0 + $0x6] sm:$0x1]  }
   0x6   :  { %13 = vrot.lane.b32.xlu0 %v102_v2, %s133_s16  ;;  %25 = vrot.lane.b32.xlu1 %v104_v3, %s134_s17  ;;  %s139_s7 = smov 56   ;;  %s140_s8 = smov 48   ;;  %v111_v11 = vld [vmem:[%s207_s0 + $0x5] sm:$0x1]   ;;  %v112_v12 = vld [vmem:[%s207_s0 + $0x4] sm:$0x1]  }
   0x7   :  { %s141_s13 = smov 40   ;;  %s142_s14 = smov 32   ;;  %v113_v13 = vld [vmem:[%s207_s0 + $0x3] sm:$0x1]   ;;  %v114_v14 = vld [vmem:[%s207_s0 + $0x2] sm:$0x1]  }
   0x8   :  { %s143_s19 = smov 24   ;;  %s144_s20 = smov 16   ;;  %v115_v15 = vld [vmem:[%s207_s0 + $0x1] sm:$0x1]   ;;  %vm27_vm4 = vcmask 851712   ;;  %vm33_vm5 = vcmask 786112  }
   0x9   :  { %s145_s0 = smov 8   ;;  %vm39_vm6 = vcmask 720512   ;;  %vm45_vm7 = vcmask 654912   ;;  %vm51_vm8 = vcmask 589312   ;;  %vm57_vm9 = vcmask 523712  }
   0xa   :  { %31 = vrot.lane.b32.xlu0 %v105_v4, %s135_s24  ;;  %37 = vrot.lane.b32.xlu1 %v106_v5, %s136_s25  ;;  %vm63_vm10 = vcmask 458112   ;;  %vm69_vm11 = vcmask 392512   ;;  %vm75_vm12 = vcmask 326912   ;;  %vm81_vm13 = vcmask 261312  }
   0xb   :  { %vm87_vm14 = vcmask 195712   ;;  %vm93_vm15 = vcmask 130112  }
   0xe   :  { %43 = vrot.lane.b32.xlu0 %v107_v7, %s137_s30  ;;  %49 = vrot.lane.b32.xlu1 %v108_v8, %s138_s2 }
  0x12   :  { %55 = vrot.lane.b32.xlu0 %v109_v9, %s139_s7  ;;  %61 = vrot.lane.b32.xlu1 %v110_v10, %s140_s8 }
  0x16   :  { %67 = vrot.lane.b32.xlu0 %v111_v11, %s141_s13  ;;  %73 = vrot.lane.b32.xlu1 %v112_v12, %s142_s14 }
  0x1a   :  { %79 = vrot.lane.b32.xlu0 %v113_v13, %s143_s19  ;;  %85 = vrot.lane.b32.xlu1 %v114_v14, %s144_s20 }
  0x1e   :  { %91 = vrot.lane.b32.xlu0 %v115_v15, %s145_s0 }
  0x74   :  { %v8_v16 = vpop.permute.xlu0 %7   ;;  %v20_v17 = vpop.permute.xlu1 %19  }
  0x75   :  { %10 = vst.msk [vmem:[#allocation0] sm:$0x1] %vm9_vm1, %v8_v16  }
  0x78   :  { %v14_v18 = vpop.permute.xlu0 %13   ;;  %v26_v19 = vpop.permute.xlu1 %25  }
  0x79   :  { %16 = vst.msk [vmem:[#allocation0] sm:$0x1] %vm15_vm2, %v14_v18  }
  0x7a   :  { %22 = vst.msk [vmem:[#allocation0] sm:$0x1] %vm21_vm3, %v20_v17  }
  0x7b   :  { %28 = vst.msk [vmem:[#allocation0] sm:$0x1] %vm27_vm4, %v26_v19  }
  0x7c   :  { %v32_v20 = vpop.permute.xlu0 %31   ;;  %v38_v21 = vpop.permute.xlu1 %37  }
  0x7d   :  { %34 = vst.msk [vmem:[#allocation0] sm:$0x1] %vm33_vm5, %v32_v20  }
  0x7e   :  { %40 = vst.msk [vmem:[#allocation0] sm:$0x1] %vm39_vm6, %v38_v21  }
  0x80   :  { %v44_v22 = vpop.permute.xlu0 %43   ;;  %v50_v23 = vpop.permute.xlu1 %49  }
  0x81   :  { %46 = vst.msk [vmem:[#allocation0] sm:$0x1] %vm45_vm7, %v44_v22  }
  0x82   :  { %52 = vst.msk [vmem:[#allocation0] sm:$0x1] %vm51_vm8, %v50_v23  }
  0x84   :  { %v56_v24 = vpop.permute.xlu0 %55   ;;  %v62_v25 = vpop.permute.xlu1 %61  }
  0x85   :  { %58 = vst.msk [vmem:[#allocation0] sm:$0x1] %vm57_vm9, %v56_v24  }
  0x86   :  { %64 = vst.msk [vmem:[#allocation0] sm:$0x1] %vm63_vm10, %v62_v25  }
  0x88   :  { %v68_v26 = vpop.permute.xlu0 %67   ;;  %v74_v27 = vpop.permute.xlu1 %73  }
  0x89   :  { %70 = vst.msk [vmem:[#allocation0] sm:$0x1] %vm69_vm11, %v68_v26  }
  0x8a   :  { %76 = vst.msk [vmem:[#allocation0] sm:$0x1] %vm75_vm12, %v74_v27  }
  0x8c   :  { %v80_v28 = vpop.permute.xlu0 %79   ;;  %v86_v29 = vpop.permute.xlu1 %85  }
  0x8d   :  { %82 = vst.msk [vmem:[#allocation0] sm:$0x1] %vm81_vm13, %v80_v28  }
  0x8e   :  { %88 = vst.msk [vmem:[#allocation0] sm:$0x1] %vm87_vm14, %v86_v29  }
  0x90   :  { %v92_v30 = vpop.permute.xlu0 %91  }
  0x91   :  { %94 = vst.msk [vmem:[#allocation0] sm:$0x1] %vm93_vm15, %v92_v30  }
  0x98   :  { %v98_v31 = vld [vmem:[#allocation0] sm:$0x1] }
  0x99   :  { %100 = vst [vmem:[%s208_s1] sm:$0x1] %v98_v31 }

// kernel: decoder_block_resnet_forward.1
= control target key start
LH: loop header
LB: loop body
LE: loop exit
PB: predicated region body
PF: predicated region fallthrough
CT: control target
= control target key end

     0   :  { %s1417_s18 = smov 0   ;;  %s1999_s0 = inlined_call_operand.vmem [shape: f32[2,18,72], index: 0, kind: input, shape index: {}]   ;;  %s2000_s1 = inlined_call_operand.vmem [shape: f32[3,72,144], index: 1, kind: input, shape index: {}]   ;;  %s2001_s2 = inlined_call_operand.vmem [shape: f32[1,144], index: 2, kind: input, shape index: {}]   ;;  %s2002_s3 = inlined_call_operand.vmem [shape: f32[3,144,256], index: 3, kind: input, shape index: {}]   ;;  %s2003_s4 = inlined_call_operand.vmem [shape: f32[1,256], index: 4, kind: input, shape index: {}]   ;;  %s2004_s5 = inlined_call_operand.vmem [shape: f32[2,16,256], index: 5, kind: output, shape index: {}]  }
   0x1 LB: > { %s1065_s19 = sadd.s32 4294967295, %s1384_s18   ;;  %p1069_p0 = scmp.ge.s32.totalorder %s1384_s18, 1  ;;  %s1384_s18 = sphi %s1417_s18, %s15_s18  }
   0x2   : > { %p187_p1 = scmp.lt.s32.totalorder %s1384_s18, 3 }
   0x4   : > { %p188_p2 = pnand %p1069_p0, %p187_p1 }
   0x5   : > { %v1074_v0 = vld [vmem:[%s2000_s1 + $0x98] sm:$0xff] (!%p188_p2)  ;;  %v1076_v1 = vld [vmem:[%s2000_s1 + $0xa8] sm:$0xff] (!%p188_p2)  ;;  %v1073_v2 = vld [vmem:[%s2000_s1 + $0x90] sm:$0xff] (!%p188_p2)  ;;  %v225_v3 = vlaneseq (!%p188_p2)  ;;  %v1386_v8 = vmov (!%p188_p2), 0.0   ;;  %p215_p3 = scmp.lt.s32.totalorder (!%p188_p2), %s1065_s19, 1  ;;  %vm276_vm1 = vcmask (!%p188_p2), 588800  }
   0x6   : > { %191 = sbr.rel (%p188_p2) target bundleno = 552 (0x228), region = 40  ;;  %v1196_v4 = vpack.c.bf16 (!%p188_p2), %v1076_v1, %v1074_v0  ;;  %v1075_v5 = vld [vmem:[%s2000_s1 + $0xa0] sm:$0xff] (!%p188_p2)  ;;  %v1078_v6 = vld [vmem:[%s2000_s1 + $0xb8] sm:$0xff] (!%p188_p2)  ;;  %v1080_v7 = vld [vmem:[%s2000_s1 + $0xc8] sm:$0xff] (!%p188_p2)  ;;  %347 = vmatprep.mubr.f32.mxu0 (!%p188_p2), %v1386_v8  ;;  %vm572_vm2 = vcmask (!%p188_p2), 130048   ;;  %vm745_vm3 = vcmask (!%p188_p2), 1040384  }
   0x7   : > { %v1198_v9 = vpack.c.bf16 (!%p188_p2), %v1075_v5, %v1073_v2  ;;  %v1200_v10 = vpack.c.bf16 (!%p188_p2), %v1080_v7, %v1078_v6  ;;  %v1077_v11 = vld [vmem:[%s2000_s1 + $0xb0] sm:$0xff] (!%p188_p2)  ;;  %v1079_v12 = vld [vmem:[%s2000_s1 + $0xc0] sm:$0xff] (!%p188_p2)  ;;  %v1082_v13 = vld [vmem:[%s2000_s1 + $0xd8] sm:$0xff] (!%p188_p2)  ;;  %vm227_vm0 = vcmp.lt.s32.totalorder (!%p188_p2), %v225_v3, 144  ;;  %vm888_vm4 = vcmask (!%p188_p2), 1046528  }
   0x8   : > { %1197 = vmatprep.subr.bf16.mxu0 (!%p188_p2), %v1196_v4  ;;  %v1084_v14 = vld [vmem:[%s2000_s1 + $0xe8] sm:$0xff] (!%p188_p2)  ;;  %230 = vst.msk [vmem:[#allocation2 + $0x17] ss:$8 sm:$0x3] (!%p188_p2), %vm227_vm0, %v1386_v8  ;;  %v1202_v15 = vpack.c.bf16 (!%p188_p2), %v1079_v12, %v1077_v11  ;;  %v1081_v17 = vld [vmem:[%s2000_s1 + $0xd0] sm:$0xff] (!%p188_p2)  ;;  %v1083_v18 = vld [vmem:[%s2000_s1 + $0xe0] sm:$0xff] (!%p188_p2) }
   0x9   : > { %233 = vst.msk [vmem:[#allocation2 + $0x40] ss:$8 sm:$0x3] (!%p188_p2), %vm227_vm0, %v1386_v8  ;;  %1199 = vmatpush1.bf16.msra.mxu0 (!%p188_p2), %v1198_v9  ;;  %v1204_v16 = vpack.c.bf16 (!%p188_p2), %v1084_v14, %v1082_v13  ;;  %v1086_v19 = vld [vmem:[%s2000_s1 + $0xf8] sm:$0xff] (!%p188_p2)  ;;  %v1088_v20 = vld [vmem:[%s2000_s1 + $0x108] sm:$0xff] (!%p188_p2)  ;;  %v1206_v21 = vpack.c.bf16 (!%p188_p2), %v1083_v18, %v1081_v17  ;;  %v1085_v23 = vld [vmem:[%s2000_s1 + $0xf0] sm:$0xff] (!%p188_p2) }
   0xa   : > { %1201 = vmatprep.subr.bf16.mxu0 (!%p188_p2), %v1200_v10  ;;  %v1208_v22 = vpack.c.bf16 (!%p188_p2), %v1088_v20, %v1086_v19  ;;  %v1087_v24 = vld [vmem:[%s2000_s1 + $0x100] sm:$0xff] (!%p188_p2)  ;;  %v1090_v26 = vld [vmem:[%s2000_s1 + $0x118] sm:$0xff] (!%p188_p2)  ;;  %v238_v27 = vld [vmem:[%s2000_s1 + $0x8] sm:$0xff] (!%p188_p2) }
   0xb   : > { %v1210_v25 = vpack.c.bf16 (!%p188_p2), %v1087_v24, %v1085_v23  ;;  %v240_v28 = vld [vmem:[%s2000_s1 + $0x18] sm:$0xff] (!%p188_p2)  ;;  %v237_v29 = vld [vmem:[%s2000_s1] sm:$0xff] (!%p188_p2)  ;;  %v239_v30 = vld [vmem:[%s2000_s1 + $0x10] sm:$0xff] (!%p188_p2) }
   0xc   : > { %v242_v31 = vld [vmem:[%s2000_s1 + $0x28] sm:$0xff] (!%p188_p2)  ;;  %v244_v32 = vld [vmem:[%s2000_s1 + $0x38] sm:$0xff] (!%p188_p2)  ;;  %v1089_v33 = vld [vmem:[%s2000_s1 + $0x110] sm:$0xff] (!%p188_p2)  ;;  %v1212_v34 = vpack.c.bf16 (!%p188_p2), %v240_v28, %v238_v27  ;;  %v1214_v36 = vpack.c.bf16 (!%p188_p2), %v239_v30, %v237_v29 }
   0xd   : > { %s2006_s19 = smov (!%p215_p3, %s1065_s19), 1  ;;  %1203 = vmatpush1.bf16.msra.mxu0 %v1202_v15  ;;  %v1216_v37 = vpack.c.bf16 %v244_v32, %v242_v31  ;;  %v241_v38 = vld [vmem:[%s2000_s1 + $0x20] sm:$0xff]  ;;  %v243_v39 = vld [vmem:[%s2000_s1 + $0x30] sm:$0xff]  ;;  %v246_v40 = vld [vmem:[%s2000_s1 + $0x48] sm:$0xff] }
   0xe   : > { %1205 = vmatprep.subr.bf16.mxu0 %v1204_v16  ;;  %s1368_s29 = smul.u32 24, %s2006_s19  ;;  %v248_v41 = vld [vmem:[%s2000_s1 + $0x58] sm:$0xff]  ;;  %v245_v42 = vld [vmem:[%s2000_s1 + $0x40] sm:$0xff]  ;;  %v583_v43 = vld [vmem:[%s2002_s3 + $0x8] sm:$0xff]  ;;  %v1218_v45 = vpack.c.bf16 %v243_v39, %v241_v38  ;;  %s1195_s10 = sshll.u32 %s2006_s19, 5 }
   0xf   : > { %v585_v44 = vld [vmem:[%s2002_s3 + $0x18] sm:$0xff]  ;;  %v582_v48 = vld [vmem:[%s2002_s3] sm:$0xff]  ;;  %v584_v49 = vld [vmem:[%s2002_s3 + $0x10] sm:$0xff]  ;;  %v1220_v50 = vpack.c.bf16 %v248_v41, %v246_v40  ;;  %s224_s14 = scalar_lea.vmem %s2004_s5, %s1195_s10 }
  0x10   : > { %s1496_s13 = scalar_lea.vmem %s1999_s0, %s1368_s29  ;;  %v1280_v47 = vpack.c.bf16 %v585_v44, %v583_v43  ;;  %v247_v51 = vld [vmem:[%s2000_s1 + $0x50] sm:$0xff]  ;;  %v250_v52 = vld [vmem:[%s2000_s1 + $0x68] sm:$0xff]  ;;  %v252_v53 = vld [vmem:[%s2000_s1 + $0x78] sm:$0xff]  ;;  %v1282_v54 = vpack.c.bf16 %v584_v49, %v582_v48 }
  0x11   : > { %1207 = vmatpush1.bf16.msra.mxu0 %v1206_v21  ;;  %v255_v35 = vld [vmem:[%s1496_s13 + $0x1] sm:$0xff]  ;;  %v256_v46 = vld [vmem:[%s1496_s13 + $0x9] sm:$0xff]  ;;  %v589_v56 = vld [vmem:[%s2002_s3 + $0x38] sm:$0xff]  ;;  %v1222_v60 = vpack.c.bf16 %v247_v51, %v245_v42  ;;  %v1224_v1 = vpack.c.bf16 %v252_v53, %v250_v52 }
  0x12   : > { %1209 = vmatprep.subr.bf16.mxu0 %v1208_v22  ;;  %1281 = vmatprep.subr.bf16.mxu1 %v1280_v47  ;;  %v587_v55 = vld [vmem:[%s2002_s3 + $0x28] sm:$0xff]  ;;  %v586_v57 = vld [vmem:[%s2002_s3 + $0x20] sm:$0xff]  ;;  %v588_v59 = vld [vmem:[%s2002_s3 + $0x30] sm:$0xff] }
  0x13   : > { %1283 = vmatpush1.bf16.msra.mxu1 %v1282_v54  ;;  %v1284_v58 = vpack.c.bf16 %v589_v56, %v587_v55  ;;  %v249_v61 = vld [vmem:[%s2000_s1 + $0x60] sm:$0xff]  ;;  %v251_v62 = vld [vmem:[%s2000_s1 + $0x70] sm:$0xff]  ;;  %v1286_v63 = vpack.c.bf16 %v588_v59, %v586_v57  ;;  %v591_v0 = vld [vmem:[%s2002_s3 + $0x48] sm:$0xff] }
  0x14   : > { %v593_v2 = vld [vmem:[%s2002_s3 + $0x58] sm:$0xff]  ;;  %v590_v4 = vld [vmem:[%s2002_s3 + $0x40] sm:$0xff]  ;;  %v592_v5 = vld [vmem:[%s2002_s3 + $0x50] sm:$0xff]  ;;  %v1226_v11 = vpack.c.bf16 %v251_v62, %v249_v61 }
  0x15   : > { %1211 = vmatpush1.bf16.msra.mxu0 %v1210_v25  ;;  %1285 = vmatprep.subr.bf16.mxu1 %v1284_v58  ;;  %v1288_v6 = vpack.c.bf16 %v593_v2, %v591_v0  ;;  %v1290_v7 = vpack.c.bf16 %v592_v5, %v590_v4  ;;  %v595_v9 = vld [vmem:[%s2002_s3 + $0x68] sm:$0xff]  ;;  %v597_v10 = vld [vmem:[%s2002_s3 + $0x78] sm:$0xff]  ;;  %v594_v13 = vld [vmem:[%s2002_s3 + $0x60] sm:$0xff] }
  0x16   : > { %299 = vmatprep.subr.mxu0 %v1090_v26  ;;  %v1292_v12 = vpack.c.bf16 %v597_v10, %v595_v9  ;;  %v596_v14 = vld [vmem:[%s2002_s3 + $0x70] sm:$0xff]  ;;  %v254_v15 = vld [vmem:[%s2000_s1 + $0x88] sm:$0xff]  ;;  %v1098_v17 = vld [vmem:[%s2000_s1 + $0x138] sm:$0xff] }
  0x17   : > { %1287 = vmatpush1.bf16.msra.mxu1 %v1286_v63  ;;  %v1096_v16 = vld [vmem:[%s2000_s1 + $0x128] sm:$0xff]  ;;  %v601_v19 = vld [vmem:[%s2002_s3 + $0x98] sm:$0xff]  ;;  %v1095_v20 = vld [vmem:[%s2000_s1 + $0x120] sm:$0xff]  ;;  %v1294_v23 = vpack.c.bf16 %v596_v14, %v594_v13 }
  0x18   : > { %1289 = vmatprep.subr.bf16.mxu1 %v1288_v6  ;;  %v599_v18 = vld [vmem:[%s2002_s3 + $0x88] sm:$0xff]  ;;  %v1097_v21 = vld [vmem:[%s2000_s1 + $0x130] sm:$0xff]  ;;  %v1102_v24 = vld [vmem:[%s2000_s1 + $0x158] sm:$0xff]  ;;  %v1228_v29 = vpack.c.bf16 %v1098_v17, %v1096_v16 }
  0x19   : > { %300 = vmatpush1.msra.mxu0 %v1089_v33  ;;  %v1100_v22 = vld [vmem:[%s2000_s1 + $0x148] sm:$0xff]  ;;  %v1296_v25 = vpack.c.bf16 %v601_v19, %v599_v18  ;;  %v598_v26 = vld [vmem:[%s2002_s3 + $0x80] sm:$0xff]  ;;  %v600_v27 = vld [vmem:[%s2002_s3 + $0x90] sm:$0xff]  ;;  %v1230_v31 = vpack.c.bf16 %v1097_v21, %v1095_v20 }
  0x1a   : > { %1213 = vmatprep.subr.bf16.mxu0 %v1212_v34  ;;  %1091 = vmatmul.mubr.msk.f32.vlgmr.msra.gmra.mrb[0].mxu0 %vm276_vm1, %v255_v35  ;;  %v253_v28 = vld [vmem:[%s2000_s1 + $0x80] sm:$0xff]  ;;  %v1232_v32 = vpack.c.bf16 %v1102_v24, %v1100_v22  ;;  %v1101_v34 = vld [vmem:[%s2000_s1 + $0x150] sm:$0xff]  ;;  %v1298_v35 = vpack.c.bf16 %v600_v27, %v598_v26  ;;  %v236_v39 = vld [vmem:[%s1496_s13 + $0x8] sm:$0xff] }
  0x1b   : > { %1215 = vmatpush1.bf16.msra.mxu0 %v1214_v36  ;;  %353 = vmatprep.mubr.f32.mxu0 %v1386_v8  ;;  %v235_v30 = vld [vmem:[%s1496_s13] sm:$0xff]  ;;  %v1104_v36 = vld [vmem:[%s2000_s1 + $0x168] sm:$0xff]  ;;  %v1105_v42 = vld [vmem:[%s2000_s1 + $0x170] sm:$0xff] }
  0x1c   : > { %1217 = vmatprep.subr.bf16.mxu0 %v1216_v37  ;;  %1291 = vmatpush1.bf16.msra.mxu1 %v1290_v7  ;;  %v1099_v33 = vld [vmem:[%s2000_s1 + $0x140] sm:$0xff]  ;;  %v1106_v37 = vld [vmem:[%s2000_s1 + $0x178] sm:$0xff]  ;;  %v1108_v43 = vld [vmem:[%s2000_s1 + $0x188] sm:$0xff] }
  0x1d   : > { %1293 = vmatprep.subr.bf16.mxu1 %v1292_v12  ;;  %v1234_v38 = vpack.c.bf16 %v1101_v34, %v1099_v33  ;;  %v1236_v40 = vpack.c.bf16 %v1106_v37, %v1104_v36  ;;  %v1103_v41 = vld [vmem:[%s2000_s1 + $0x160] sm:$0xff]  ;;  %v1110_v44 = vld [vmem:[%s2000_s1 + $0x198] sm:$0xff]  ;;  %v1109_v48 = vld [vmem:[%s2000_s1 + $0x190] sm:$0xff] }
  0x1e   : > { %1092 = vmatmul.mubr.msk.f32.gmra.mrb[2].mxu0 %vm276_vm1, %v256_v46  ;;  %v1240_v46 = vpack.c.bf16 %v1110_v44, %v1108_v43  ;;  %v1107_v47 = vld [vmem:[%s2000_s1 + $0x180] sm:$0xff]  ;;  %v1116_v51 = vld [vmem:[%s2002_s3 + $0x128] sm:$0xff]  ;;  %v1118_v52 = vld [vmem:[%s2002_s3 + $0x138] sm:$0xff] }
  0x1f   : > { %1219 = vmatpush1.bf16.msra.mxu0 %v1218_v45  ;;  %430 = vmatprep.mubr.f32.mxu0 %v1386_v8  ;;  %v1238_v45 = vpack.c.bf16 %v1105_v42, %v1103_v41  ;;  %v1242_v49 = vpack.c.bf16 %v1109_v48, %v1107_v47  ;;  %v1115_v53 = vld [vmem:[%s2002_s3 + $0x120] sm:$0xff]  ;;  %v1117_v54 = vld [vmem:[%s2002_s3 + $0x130] sm:$0xff]  ;;  %v1120_v55 = vld [vmem:[%s2002_s3 + $0x148] sm:$0xff]  ;;  %v1244_v58 = vpack.c.bf16 %v1118_v52, %v1116_v51 }
  0x20   : > { %1221 = vmatprep.subr.bf16.mxu0 %v1220_v50  ;;  %1295 = vmatpush1.bf16.msra.mxu1 %v1294_v23  ;;  %v1112_v50 = vld [vmem:[%s2000_s1 + $0x1a8] sm:$0xff]  ;;  %v1122_v56 = vld [vmem:[%s2002_s3 + $0x158] sm:$0xff]  ;;  %v1111_v57 = vld [vmem:[%s2000_s1 + $0x1a0] sm:$0xff] }
  0x21   : > { %1297 = vmatprep.subr.bf16.mxu1 %v1296_v25  ;;  %v443_v59 = vld [vmem:[%s1496_s13 + $0x2] sm:$0xff]  ;;  %v1248_v61 = vpack.c.bf16 %v1122_v56, %v1120_v55  ;;  %v1121_v63 = vld [vmem:[%s2002_s3 + $0x150] sm:$0xff]  ;;  %v1138_v21 = vld [vmem:[%s2002_s3 + $0x1d8] sm:$0xff] }
  0x22   : > { %v1119_v62 = vld [vmem:[%s2002_s3 + $0x140] sm:$0xff]  ;;  %v1124_v0 = vld [vmem:[%s2002_s3 + $0x168] sm:$0xff]  ;;  %v1125_v7 = vld [vmem:[%s2002_s3 + $0x170] sm:$0xff] }
  0x23   : > { %1223 = vmatpush1.bf16.msra.mxu0 %v1222_v60  ;;  %v1246_v60 = vpack.c.bf16 %v1117_v54, %v1115_v53  ;;  %v444_v2 = vld [vmem:[%s1496_s13 + $0xa] sm:$0xff]  ;;  %v1250_v4 = vpack.c.bf16 %v1121_v63, %v1119_v62  ;;  %v1123_v6 = vld [vmem:[%s2002_s3 + $0x160] sm:$0xff]  ;;  %v1142_v34 = vld [vmem:[%s2002_s3 + $0x1f8] sm:$0xff] }
  0x24   : > { %1225 = vmatprep.subr.bf16.mxu0 %v1224_v1  ;;  %1299 = vmatpush1.bf16.msra.mxu1 %v1298_v35  ;;  %v1126_v1 = vld [vmem:[%s2002_s3 + $0x178] sm:$0xff]  ;;  %v1128_v9 = vld [vmem:[%s2002_s3 + $0x188] sm:$0xff]  ;;  %v1254_v10 = vpack.c.bf16 %v1125_v7, %v1123_v6  ;;  %v1127_v12 = vld [vmem:[%s2002_s3 + $0x180] sm:$0xff] }
  0x25   : > { %v1252_v5 = vpack.c.bf16 %v1126_v1, %v1124_v0  ;;  %v1129_v13 = vld [vmem:[%s2002_s3 + $0x190] sm:$0xff]  ;;  %v1132_v14 = vld [vmem:[%s2002_s3 + $0x1a8] sm:$0xff]  ;;  %v1131_v18 = vld [vmem:[%s2002_s3 + $0x1a0] sm:$0xff] }
  0x26   : > { %v1258_v16 = vpack.c.bf16 %v1129_v13, %v1127_v12  ;;  %v1133_v19 = vld [vmem:[%s2002_s3 + $0x1b0] sm:$0xff]  ;;  %v1136_v20 = vld [vmem:[%s2002_s3 + $0x1c8] sm:$0xff]  ;;  %v1135_v24 = vld [vmem:[%s2002_s3 + $0x1c0] sm:$0xff] }
  0x27   : > { %1227 = vmatpush1.bf16.msra.mxu0 %v1226_v11  ;;  %v1262_v22 = vpack.c.bf16 %v1133_v19, %v1131_v18  ;;  %v1264_v23 = vpack.c.bf16 %v1138_v21, %v1136_v20  ;;  %v1137_v25 = vld [vmem:[%s2002_s3 + $0x1d0] sm:$0xff]  ;;  %v603_v27 = vld [vmem:[%s2002_s3 + $0xa8] sm:$0xff]  ;;  %v1139_v36 = vld [vmem:[%s2002_s3 + $0x1e0] sm:$0xff] }
  0x28   : > { %382 = vmatprep.subr.mxu0 %v254_v15  ;;  %v1134_v15 = vld [vmem:[%s2002_s3 + $0x1b8] sm:$0xff]  ;;  %v1266_v26 = vpack.c.bf16 %v1137_v25, %v1135_v24  ;;  %v1140_v33 = vld [vmem:[%s2002_s3 + $0x1e8] sm:$0xff]  ;;  %v1141_v37 = vld [vmem:[%s2002_s3 + $0x1f0] sm:$0xff] }
  0x29   : > { %v1260_v17 = vpack.c.bf16 %v1134_v15, %v1132_v14  ;;  %v1268_v35 = vpack.c.bf16 %v1142_v34, %v1140_v33  ;;  %v606_v42 = vld [vmem:[%s2002_s3 + $0xc0] sm:$0xff]  ;;  %v608_v43 = vld [vmem:[%s2002_s3 + $0xd0] sm:$0xff]  ;;  %v611_v51 = vld [vmem:[%s2002_s3 + $0xe8] sm:$0xff] }
  0x2a   : > { %v1306_v44 = vpack.c.bf16 %v608_v43, %v606_v42  ;;  %v1143_v48 = vld [vmem:[%s2002_s3 + $0x200] sm:$0xff]  ;;  %v613_v52 = vld [vmem:[%s2002_s3 + $0xf8] sm:$0xff]  ;;  %v612_v55 = vld [vmem:[%s2002_s3 + $0xf0] sm:$0xff] }
  0x2b   : > { %383 = vmatpush1.msra.mxu0 %v253_v28  ;;  %v605_v28 = vld [vmem:[%s2002_s3 + $0xb8] sm:$0xff]  ;;  %v1308_v53 = vpack.c.bf16 %v613_v52, %v611_v51  ;;  %v610_v54 = vld [vmem:[%s2002_s3 + $0xe0] sm:$0xff]  ;;  %v615_v63 = vld [vmem:[%s2002_s3 + $0x108] sm:$0xff] }
  0x2c   : > { %1229 = vmatprep.subr.bf16.mxu0 %v1228_v29  ;;  %1093 = vmatmul.mubr.msk.f32.vlgmr.msra.gmra.mrb[0].mxu0 %vm276_vm1, %v235_v30  ;;  %v1300_v29 = vpack.c.bf16 %v605_v28, %v603_v27  ;;  %v602_v30 = vld [vmem:[%s2002_s3 + $0xa0] sm:$0xff]  ;;  %v1310_v56 = vpack.c.bf16 %v612_v55, %v610_v54  ;;  %v617_v0 = vld [vmem:[%s2002_s3 + $0x118] sm:$0xff]  ;;  %v1156_v6 = vld [vmem:[%s2002_s3 + $0x248] sm:$0xff] }
  0x2d   : > { %1231 = vmatpush1.bf16.msra.mxu0 %v1230_v31  ;;  %436 = vmatprep.mubr.f32.mxu0 %v1386_v8  ;;  %v604_v31 = vld [vmem:[%s2002_s3 + $0xb0] sm:$0xff]  ;;  %v1312_v1 = vpack.c.bf16 %v617_v0, %v615_v63  ;;  %v1158_v7 = vld [vmem:[%s2002_s3 + $0x258] sm:$0xff]  ;;  %v1160_v34 = vld [vmem:[%s2002_s3 + $0x268] sm:$0xff] }
  0x2e   : > { %1233 = vmatprep.subr.bf16.mxu0 %v1232_v32  ;;  %v1302_v32 = vpack.c.bf16 %v604_v31, %v602_v30  ;;  %1301 = vmatprep.subr.bf16.mxu1 %v1300_v29  ;;  %v576_v27 = vld [vmem:[#allocation2 + $0x10] sm:$0x80]  ;;  %v1155_v29 = vld [vmem:[%s2002_s3 + $0x240] sm:$0xff]  ;;  %v1164_v43 = vld [vmem:[%s2002_s3 + $0x288] sm:$0xff] }
  0x2f   : > { %v1157_v30 = vld [vmem:[%s2002_s3 + $0x250] sm:$0xff]  ;;  %v1167_v0 = vld [vmem:[%s2002_s3 + $0x2a0] sm:$0xff] }
  0x30   : > { %1094 = vmatmul.mubr.msk.f32.gmra.mrb[2].mxu0 %vm276_vm1, %v236_v39  ;;  %1303 = vmatpush1.bf16.msra.mxu1 %v1302_v32  ;;  %v607_v39 = vld [vmem:[%s2002_s3 + $0xc8] sm:$0xff]  ;;  %v746_v32 = vrot.slane %v576_v27, 7 }
  0x31   : > { %1235 = vmatpush1.bf16.msra.mxu0 %v1234_v38  ;;  %534 = vmatprep.mubr.f32.mxu0 %v1386_v8  ;;  %v1270_v38 = vpack.c.bf16 %v1141_v37, %v1139_v36  ;;  %v1318_v37 = vpack.c.bf16 %v1157_v30, %v1155_v29  ;;  %v1185_v29 = vld [vmem:[%s2002_s3 + $0x330] sm:$0xff]  ;;  %v1188_v30 = vld [vmem:[%s2002_s3 + $0x348] sm:$0xff] }
  0x32   : > { %1237 = vmatprep.subr.bf16.mxu0 %v1236_v40  ;;  %v609_v40 = vld [vmem:[%s2002_s3 + $0xd8] sm:$0xff] }
  0x33   : > { %v1304_v41 = vpack.c.bf16 %v609_v40, %v607_v39  ;;  %v1161_v39 = vld [vmem:[%s2002_s3 + $0x270] sm:$0xff] }
  0x35   : > { %1239 = vmatpush1.bf16.msra.mxu0 %v1238_v45  ;;  %v1144_v45 = vld [vmem:[%s2002_s3 + $0x208] sm:$0xff]  ;;  %1305 = vmatprep.subr.bf16.mxu1 %v1304_v41 }
  0x36   : > { %1241 = vmatprep.subr.bf16.mxu0 %v1240_v46  ;;  %v1146_v46 = vld [vmem:[%s2002_s3 + $0x218] sm:$0xff]  ;;  %1307 = vmatpush1.bf16.msra.mxu1 %v1306_v44 }
  0x37   : > { %v1272_v47 = vpack.c.bf16 %v1146_v46, %v1144_v45  ;;  %1309 = vmatprep.subr.bf16.mxu1 %v1308_v53  ;;  %v1166_v44 = vld [vmem:[%s2002_s3 + $0x298] sm:$0xff] }
  0x38   : > { %v1324_v55 = vpack.c.bf16 %v1166_v44, %v1164_v43 }
  0x39   : > { %1243 = vmatpush1.bf16.msra.mxu0 %v1242_v49  ;;  %v1145_v49 = vld [vmem:[%s2002_s3 + $0x210] sm:$0xff] }
  0x3a   : > { %486 = vmatprep.subr.mxu0 %v1112_v50  ;;  %v1274_v50 = vpack.c.bf16 %v1145_v49, %v1143_v48  ;;  %1311 = vmatpush1.bf16.msra.mxu1 %v1310_v56  ;;  %v1163_v56 = vld [vmem:[%s2002_s3 + $0x280] sm:$0xff] }
  0x3b   : > { %1313 = vmatprep.subr.bf16.mxu1 %v1312_v1  ;;  %v1169_v1 = vld [vmem:[%s2002_s3 + $0x2b0] sm:$0xff] }
  0x3d   : > { %487 = vmatpush1.msra.mxu0 %v1111_v57  ;;  %v1148_v57 = vld [vmem:[%s2002_s3 + $0x228] sm:$0xff] }
  0x3e   : > { %1113 = vmatmul.mubr.msk.f32.vlgmr.msra.gmra.mrb[0].mxu0 %vm276_vm1, %v443_v59  ;;  %1245 = vmatprep.subr.bf16.mxu0 %v1244_v58  ;;  %v1150_v58 = vld [vmem:[%s2002_s3 + $0x238] sm:$0xff] }
  0x3f   : > { %540 = vmatprep.mubr.f32.mxu0 %v1386_v8  ;;  %1247 = vmatpush1.bf16.msra.mxu0 %v1246_v60  ;;  %v1130_v8 = vld [vmem:[%s2002_s3 + $0x198] sm:$0xff]  ;;  %v1276_v59 = vpack.c.bf16 %v1150_v58, %v1148_v57  ;;  %v1147_v60 = vld [vmem:[%s2002_s3 + $0x220] sm:$0xff]  ;;  %v1165_v57 = vld [vmem:[%s2002_s3 + $0x290] sm:$0xff] }
  0x40   : > { %1249 = vmatprep.subr.bf16.mxu0 %v1248_v61  ;;  %v1256_v11 = vpack.c.bf16 %v1130_v8, %v1128_v9  ;;  %v1149_v61 = vld [vmem:[%s2002_s3 + $0x230] sm:$0xff]  ;;  %v1316_v9 = vpack.c.bf16 %v1158_v7, %v1156_v6  ;;  %v1843_v8 = vshrl.u32 %v225_v3, 7  ;;  %v1171_v7 = vld [vmem:[%s2002_s3 + $0x2c0] sm:$0xff] }
  0x41   : > { %v1278_v62 = vpack.c.bf16 %v1149_v61, %v1147_v60  ;;  %v1170_v60 = vld [vmem:[%s2002_s3 + $0x2b8] sm:$0xff] }
  0x42   : > { %1114 = vmatmul.mubr.msk.f32.gmra.mrb[2].mxu0 %vm276_vm1, %v444_v2  ;;  %v614_v2 = vld [vmem:[%s2002_s3 + $0x100] sm:$0xff]  ;;  %v559_v12 = vsub.s32 1, %v1843_v8 }
  0x43   : > { %1251 = vmatpush1.bf16.msra.mxu0 %v1250_v4  ;;  %v616_v4 = vld [vmem:[%s2002_s3 + $0x110] sm:$0xff] }
  0x44   : > { %1253 = vmatprep.subr.bf16.mxu0 %v1252_v5  ;;  %v1314_v5 = vpack.c.bf16 %v616_v4, %v614_v2  ;;  %v1172_v2 = vld [vmem:[%s2002_s3 + $0x2c8] sm:$0xff]  ;;  %v1174_v4 = vld [vmem:[%s2002_s3 + $0x2d8] sm:$0xff] }
  0x45   : > { %v1332_v6 = vpack.c.bf16 %v1174_v4, %v1172_v2 }
  0x46   : > { %1315 = vmatpush1.bf16.msra.mxu1 %v1314_v5  ;;  %v1330_v5 = vpack.c.bf16 %v1169_v1, %v1167_v0 }
  0x47   : > { %1255 = vmatpush1.bf16.msra.mxu0 %v1254_v10  ;;  %1317 = vmatprep.subr.bf16.mxu1 %v1316_v9  ;;  %v555_v10 = vsub.s32 0, %v1843_v8  ;;  %v1173_v9 = vld [vmem:[%s2002_s3 + $0x2d0] sm:$0xff] }
  0x48   : > { %1257 = vmatprep.subr.bf16.mxu0 %v1256_v11  ;;  %v551_v11 = vld [vmem:[%s2001_s2] sm:$0x3] }
  0x49   : > { %v556_v13 = vrot.slane %v551_v11, %v555_v10  ;;  %v560_v14 = vrot.slane %v551_v11, %v559_v12  ;;  %v1176_v11 = vld [vmem:[%s2002_s3 + $0x2e8] sm:$0xff] }
  0x4b   : > { %1259 = vmatpush1.bf16.msra.mxu0 %v1258_v16 }
  0x4c   : > { %1261 = vmatprep.subr.bf16.mxu0 %v1260_v17 }
  0x4f   : > { %1263 = vmatpush1.bf16.msra.mxu0 %v1262_v22 }
  0x50   : > { %1265 = vmatprep.subr.bf16.mxu0 %v1264_v23 }
  0x53   : > { %1267 = vmatpush1.bf16.msra.mxu0 %v1266_v26  ;;  %v577_v26 = vld [vmem:[#allocation2 + $0x18] sm:$0x80] }
  0x54   : > { %1269 = vmatprep.subr.bf16.mxu0 %v1268_v35  ;;  %v749_v28 = vrot.slane %v577_v26, 7  ;;  %v1162_v35 = vld [vmem:[%s2002_s3 + $0x278] sm:$0xff] }
  0x55   : > { %v1320_v41 = vpack.c.bf16 %v1162_v35, %v1160_v34  ;;  %v1187_v34 = vld [vmem:[%s2002_s3 + $0x340] sm:$0xff]  ;;  %v1189_v35 = vld [vmem:[%s2002_s3 + $0x350] sm:$0xff] }
  0x57   : > { %1271 = vmatpush1.bf16.msra.mxu0 %v1270_v38  ;;  %v1159_v38 = vld [vmem:[%s2002_s3 + $0x260] sm:$0xff] }
  0x58   : > { %1273 = vmatprep.subr.bf16.mxu0 %v1272_v47  ;;  %v1322_v52 = vpack.c.bf16 %v1161_v39, %v1159_v38  ;;  %v844_v38 = vld [vmem:[#allocation2 + $0x48] sm:$0x1] }
  0x5b   : > { %1275 = vmatpush1.bf16.msra.mxu0 %v1274_v50 }
  0x5c   : > { %1277 = vmatprep.subr.bf16.mxu0 %v1276_v59  ;;  %v1168_v59 = vld [vmem:[%s2002_s3 + $0x2a8] sm:$0xff] }
  0x5d   : > { %v1328_v63 = vpack.c.bf16 %v1170_v60, %v1168_v59 }
  0x5f   : > { %1279 = vmatpush1.bf16.msra.mxu0 %v1278_v62  ;;  %v1326_v62 = vpack.c.bf16 %v1165_v57, %v1163_v56 }
 0x111   : > { %v536_v15 = vpop.f32.mrb[0].mxu0 }
 0x112   : > { %v563_v16 = vadd.f32 %v556_v13, %v536_v15  ;;  %v538_v17 = vpop.f32.mrb[1].mxu0 }
 0x113   : > { %v564_v18 = vadd.f32 %v560_v14, %v538_v17  ;;  %v1177_v17 = vld [vmem:[%s2002_s3 + $0x2f0] sm:$0xff] }
 0x114   : > { %v567_v3 = vmax.f32 %v563_v16, 0.0  ;;  %v1175_v16 = vld [vmem:[%s2002_s3 + $0x2e0] sm:$0xff] }
 0x115   : > { %v568_v19 = vmax.f32 %v564_v18, 0.0  ;;  %v542_v20 = vpop.f32.mrb[2].mxu0  ;;  %v1180_v18 = vld [vmem:[%s2002_s3 + $0x308] sm:$0xff] }
 0x116   : > { %571 = vst [vmem:[#allocation2 + $0x20] sm:$0xff] %v567_v3  ;;  %v565_v21 = vadd.f32 %v556_v13, %v542_v20  ;;  %v544_v22 = vpop.f32.mrb[3].mxu0  ;;  %v747_v33 = vrot.slane %v567_v3, 7  ;;  %v1178_v13 = vld [vmem:[%s2002_s3 + $0x2f8] sm:$0xff] }
 0x117   : > { %573 = vst.msk [vmem:[#allocation2 + $0x28] sm:$0xff] %vm572_vm2, %v568_v19  ;;  %v566_v23 = vadd.f32 %v560_v14, %v544_v22  ;;  %v1334_v14 = vpack.c.bf16 %v1173_v9, %v1171_v7  ;;  %v1336_v15 = vpack.c.bf16 %v1178_v13, %v1176_v11  ;;  %v1338_v19 = vpack.c.bf16 %v1177_v17, %v1175_v16  ;;  %v1181_v22 = vld [vmem:[%s2002_s3 + $0x310] sm:$0xff] }
 0x118   : > { %v1855_v24 = vmax.f32 %v565_v21, 0.0  ;;  %v748_v46 = vsel %vm745_vm3, %v746_v32, %v747_v33  ;;  %v1179_v21 = vld [vmem:[%s2002_s3 + $0x300] sm:$0xff] }
 0x119   : > { %v570_v25 = vmax.f32 %v566_v23, 0.0  ;;  %v1184_v23 = vld [vmem:[%s2002_s3 + $0x328] sm:$0xff]  ;;  %v1342_v26 = vpack.c.bf16 %v1181_v22, %v1179_v21 }
 0x11a   : > { %574 = vst [vmem:[#allocation2 + $0x30] sm:$0xff] %v1855_v24 }
 0x11b   : > { %575 = vst.msk [vmem:[#allocation2 + $0x38] sm:$0xff] %vm572_vm2, %v570_v25  ;;  %v1186_v25 = vld [vmem:[%s2002_s3 + $0x338] sm:$0xff] }
 0x11c   : > { %v1344_v27 = vpack.c.bf16 %v1186_v25, %v1184_v23 }
 0x11e   : > { %v579_v31 = vld [vmem:[#allocation2 + $0x28] sm:$0xff] }
 0x11f   : > { %1151 = vmatprep.mubr.msk.f32.mxu0 %vm572_vm2, %v579_v31  ;;  %v750_v36 = vrot.slane %v579_v31, 7  ;;  %v840_v49 = vld [vmem:[#allocation2 + $0x28] sm:$0xfe]  ;;  %v1190_v31 = vld [vmem:[%s2002_s3 + $0x358] sm:$0xff] }
 0x120   : > { %728 = vmatmul.mubr.f32.vlgmr.msra.gmra.mrb[4].mxu0 %v567_v3  ;;  %v892_v54 = vrot.slane %v840_v49, 1  ;;  %v1182_v3 = vld [vmem:[%s2002_s3 + $0x318] sm:$0xff] }
 0x121   : > { %v751_v40 = vsel %vm745_vm3, %v749_v28, %v750_v36  ;;  %v580_v42 = vld [vmem:[#allocation2 + $0x30] sm:$0x7f]  ;;  %v1340_v20 = vpack.c.bf16 %v1182_v3, %v1180_v18  ;;  %v1183_v28 = vld [vmem:[%s2002_s3 + $0x320] sm:$0xff] }
 0x122   : > { %1153 = vmatprep.mubr.msk.f32.mxu1 %vm572_vm2, %v751_v40  ;;  %v1886_v45 = vld [vmem:[#allocation2 + $0x38] sm:$0xff]  ;;  %v752_v48 = vrot.slane %v580_v42, 7  ;;  %v1346_v32 = vpack.c.bf16 %v1185_v29, %v1183_v28  ;;  %v897_v40 = vrot.slane %v844_v38, 1  ;;  %v890_v42 = vrot.slane %v1855_v24, 1 }
 0x123   : > { %v581_v47 = vld [vmem:[#allocation2 + $0x38] sm:$0x7f]  ;;  %1152 = vmatprep.mubr.msk.f32.mxu0 %vm572_vm2, %v1886_v45  ;;  %827 = vmatmul.mubr.f32.vlgmr.msra.gmra.mrb[0].mxu1 %v748_v46  ;;  %v893_v51 = vrot.slane %v1886_v45, 1 }
 0x124   : > { %v754_v50 = vrot.slane %v581_v47, 7  ;;  %1319 = vmatpush1.bf16.msra.mxu1 %v1318_v37  ;;  %734 = vmatmul.mubr.f32.gmra.mrb[6].mxu0 %v1855_v24  ;;  %v753_v58 = vsel %vm745_vm3, %v747_v33, %v752_v48  ;;  %v1348_v33 = vpack.c.bf16 %v1190_v31, %v1188_v30  ;;  %v1350_v37 = vpack.c.bf16 %v1189_v35, %v1187_v34  ;;  %v986_v24 = vld [vmem:[%s2003_s4] sm:$0x3] }
 0x125   : > { %1321 = vmatprep.subr.bf16.mxu1 %v1320_v41  ;;  %v894_v61 = vsel %vm888_vm4, %v892_v54, %v893_v51  ;;  %v843_v41 = vld [vmem:[#allocation2 + $0x40] sm:$0x1]  ;;  %v898_v46 = vsel %vm888_vm4, %v893_v51, %v897_v40  ;;  %v995_v45 = vrot.slane %v986_v24, %v559_v12 }
 0x126   : > { %v755_v53 = vsel %vm745_vm3, %v750_v36, %v754_v50  ;;  %v839_v36 = vld [vmem:[#allocation2 + $0x20] sm:$0xfe]  ;;  %v895_v44 = vrot.slane %v843_v41, 1 }
 0x127   : > { %1154 = vmatprep.mubr.msk.f32.mxu1 %vm572_vm2, %v755_v53  ;;  %v889_v39 = vrot.slane %v839_v36, 1  ;;  %v991_v53 = vrot.slane %v986_v24, %v555_v10 }
 0x128   : > { %833 = vmatmul.mubr.f32.gmra.mrb[2].mxu1 %v753_v58  ;;  %v896_v47 = vsel %vm888_vm4, %v890_v42, %v895_v44 }
 0x129   : > { %1323 = vmatpush1.bf16.msra.mxu1 %v1322_v52  ;;  %1191 = vmatprep.mubr.msk.f32.mxu1 %vm572_vm2, %v894_v61  ;;  %v891_v43 = vsel %vm888_vm4, %v889_v39, %v890_v42 }
 0x12a   : > { %1325 = vmatprep.subr.bf16.mxu1 %v1324_v55 }
 0x12d   : > { %1327 = vmatpush1.bf16.msra.mxu1 %v1326_v62 }
 0x12e   : > { %1329 = vmatprep.subr.bf16.mxu1 %v1328_v63 }
 0x131   : > { %1331 = vmatpush1.bf16.msra.mxu1 %v1330_v5 }
 0x132   : > { %1333 = vmatprep.subr.bf16.mxu1 %v1332_v6 }
 0x135   : > { %1335 = vmatpush1.bf16.msra.mxu1 %v1334_v14 }
 0x136   : > { %1337 = vmatprep.subr.bf16.mxu1 %v1336_v15 }
 0x139   : > { %1339 = vmatpush1.bf16.msra.mxu1 %v1338_v19 }
 0x13a   : > { %1341 = vmatprep.subr.bf16.mxu1 %v1340_v20 }
 0x13d   : > { %1343 = vmatpush1.bf16.msra.mxu1 %v1342_v26 }
 0x13e   : > { %1345 = vmatprep.subr.bf16.mxu1 %v1344_v27 }
 0x141   : > { %1347 = vmatpush1.bf16.msra.mxu1 %v1346_v32 }
 0x142   : > { %1349 = vmatprep.subr.bf16.mxu1 %v1348_v33 }
 0x145   : > { %1351 = vmatpush1.bf16.msra.mxu1 %v1350_v37 }
 0x148   : > { %970 = vmatmul.mubr.f32.vlgmr.msra.gmra.mrb[0].mxu1 %v891_v43 }
 0x149   : > { %1192 = vmatprep.mubr.msk.f32.mxu1 %vm572_vm2, %v898_v46 }
 0x14c   : > { %976 = vmatmul.mubr.f32.gmra.mrb[2].mxu1 %v896_v47 }
 0x1f3   : > { %v729_v48 = vpop.f32.mrb[4].mxu0 }
 0x1f4   : > { %v731_v49 = vpop.f32.mrb[5].mxu0 }
 0x1f7   : > { %v735_v50 = vpop.f32.mrb[6].mxu0 }
 0x1f8   : > { %v737_v52 = vpop.f32.mrb[7].mxu0 }
 0x21b   : > { %v971_v54 = vpop.f32.mrb[0].mxu1 }
 0x21c   : > { %v1352_v51 = vadd.f32 %v971_v54, %v729_v48  ;;  %v973_v55 = vpop.f32.mrb[1].mxu1 }
 0x21d   : > { %v1353_v56 = vadd.f32 %v973_v55, %v731_v49 }
 0x21e   : > { %v998_v57 = vadd.f32 %v1352_v51, %v991_v53 }
 0x21f   : > { %v999_v58 = vadd.f32 %v1353_v56, %v995_v45  ;;  %v977_v59 = vpop.f32.mrb[2].mxu1 }
 0x220   : > { %v1002_v60 = vmax.f32 %v998_v57, 0.0  ;;  %v1354_v61 = vadd.f32 %v977_v59, %v735_v50  ;;  %v979_v62 = vpop.f32.mrb[3].mxu1 }
 0x221   : > { %v1003_v63 = vmax.f32 %v999_v58, 0.0  ;;  %v1355_v10 = vadd.f32 %v979_v62, %v737_v52 }
 0x222   : > { %1006 = vst [vmem:[%s224_s14] sm:$0xff] %v1002_v60  ;;  %v1000_v0 = vadd.f32 %v1354_v61, %v991_v53 }
 0x223   : > { %1007 = vst [vmem:[%s224_s14 + $0x8] sm:$0xff] %v1003_v63  ;;  %v1001_v8 = vadd.f32 %v1355_v10, %v995_v45 }
 0x224   : > { %v1004_v12 = vmax.f32 %v1000_v0, 0.0 }
 0x225   : > { %v1005_v1 = vmax.f32 %v1001_v8, 0.0 }
 0x226   : > { %1008 = vst [vmem:[%s224_s14 + $0x10] sm:$0xff] %v1004_v12 }
 0x227   : > { %1009 = vst [vmem:[%s224_s14 + $0x18] sm:$0xff] %v1005_v1 }
 0x228 PF: > { %s15_s18 = sadd.s32 1, %s1384_s18  }
 0x229   : > { %p12_p4 = scmp.ge.s32.totalorder %s15_s18, 4  }
 0x22b   :  { %14 = sbr.rel (!%p12_p4) target bundleno = 1 (0x1), region = 76 }

</bundles_post_ra>
